<compile_context>
chip_gen: v5e
topology: v5e:2x2
jax: 0.10.0
libtpu: 0.0.40
codegen_flags: <defaults>
</compile_context>

<pallas_src>
import jax
import jax.numpy as jnp
from jax.experimental import pallas as pl
from jax.experimental.pallas import tpu as pltpu

# Hyperparameters (the PyTorch script reads them from data; fixed small values here)
INPUT_DIM = 32
NODES_L1 = 64
NODES_L2 = 32
NODES_L3 = 16
NUM_CLASSES = 5
BATCH = 256          # enough rows to exercise the batch grid / megacore split

LANE = 128           # padded output-lane width for hidden-layer weights (MXU N dim)
OUT_LANES = 8        # classes padded 5 -> 8: tiny full-dim (TB, 8) output block
NEG = -1e30          # bias for padded class lanes (exp underflows to exactly 0)


def _round_up(n, m):
    return (n + m - 1) // m * m


def _pick_batch_tile(rows):
    """Per-generation batch tile (rows already a multiple of 8).

    v7x: 2 TensorCores -> keep the grid length a multiple of 2 (even split).
    v6e: 1 TC -> one big tile for small batches, 1024-row tiles for large ones.
    v5e: tiles up to 512 rows (the M dim streams through the MXU; it does not
         need to match the 128x128 MXU edge)."""
    try:
        kind = jax.devices()[0].device_kind.lower()
    except Exception:
        kind = ""
    if "v7" in kind:
        half = _round_up(max(rows // 2, 8), 8)
        return min(half, 4096)
    if "v5" in kind:
        return min(rows, 512)
    return min(rows, 1024)      # v6e and default


def sae_kernel(x_ref,
               w1_ref, b1_ref,
               w2_ref, b2_ref,
               w3_ref, b3_ref,
               w4_ref, b4_ref,
               out_ref):
    """One (TB, 32) batch tile: 4 MXU matmuls (K at true size), ReLU on VPU,
    softmax over 8 class lanes (VPU/EUP/XLU)."""
    # bf16 cast in-kernel; the wrapper streams raw f32 (no separate XLA pad/cast op).
    x = x_ref[...].astype(jnp.bfloat16)                      # (TB, 32)

    # encoder1: (TB,32) x (32,128) -> f32 (TB,128), bias, ReLU, back to bf16
    h1 = jnp.dot(x, w1_ref[...], preferred_element_type=jnp.float32) + b1_ref[...]
    h1 = jnp.maximum(h1, 0.0).astype(jnp.bfloat16)

    # encoder2: contract only the 64 real features (K not zero-padded)
    h2 = jnp.dot(h1[:, :NODES_L1], w2_ref[...],
                 preferred_element_type=jnp.float32) + b2_ref[...]
    h2 = jnp.maximum(h2, 0.0).astype(jnp.bfloat16)

    # encoder3
    h3 = jnp.dot(h2[:, :NODES_L2], w3_ref[...],
                 preferred_element_type=jnp.float32) + b3_ref[...]
    h3 = jnp.maximum(h3, 0.0).astype(jnp.bfloat16)

    # final_layer: Linear + Softmax(dim=1).  Padded class lanes carry a -1e30 bias,
    # so exp(logit - m) underflows to exactly 0 there and they don't pollute the sum.
    logits = jnp.dot(h3[:, :NODES_L3], w4_ref[...],
                     preferred_element_type=jnp.float32) + b4_ref[...]
    logits = logits[:, :OUT_LANES]                           # (TB, 8)
    m = jnp.max(logits, axis=1, keepdims=True)
    e = jnp.exp(logits - m)
    denom = jnp.sum(e, axis=1, keepdims=True)
    out_ref[...] = e * pl.reciprocal(denom, approx=True)     # (TB, 8) f32


def sae_forward(x, params, batch_tile=None):
    """x: (B, INPUT_DIM) float32. params: dict of (w, b) per layer, w already (in, out)."""
    B = x.shape[0]
    rows = _round_up(B, 8)
    TB = batch_tile or _pick_batch_tile(rows)
    n_tiles = pl.cdiv(rows, TB)
    B_pad = n_tiles * TB

    w1, b1 = params["l1"]
    w2, b2 = params["l2"]
    w3, b3 = params["l3"]
    w4, b4 = params["l4"]

    # x keeps its true feature width; only batch rows are padded (no-op when B == B_pad).
    xp = x if B_pad == B else jnp.pad(x, ((0, B_pad - B), (0, 0)))

    # Weights: pad only the output (N) lane dim to 128; K dims stay at their true size.
    def pad_n_bf16(w):
        return jnp.pad(w, ((0, 0), (0, LANE - w.shape[1]))).astype(jnp.bfloat16)

    def pad_b(b, fill=0.0):
        return jnp.pad(b, ((0, 0), (0, LANE - b.shape[1])), constant_values=fill)

    w1p, w2p, w3p, w4p = pad_n_bf16(w1), pad_n_bf16(w2), pad_n_bf16(w3), pad_n_bf16(w4)
    b1p, b2p, b3p = pad_b(b1), pad_b(b2), pad_b(b3)          # f32, zero-padded
    b4p = pad_b(b4, NEG)                                     # mask padded class lanes

    x_spec = pl.BlockSpec((TB, INPUT_DIM), lambda i: (i, 0))
    out_spec = pl.BlockSpec((TB, OUT_LANES), lambda i: (i, 0))

    def full(shape):                                         # VMEM-resident across steps
        return pl.BlockSpec(shape, lambda i: (0, 0))

    out_padded = pl.pallas_call(
        sae_kernel,
        out_shape=jax.ShapeDtypeStruct((B_pad, OUT_LANES), jnp.float32),
        grid=(n_tiles,),
        in_specs=[x_spec,
                  full((INPUT_DIM, LANE)), full((1, LANE)),
                  full((NODES_L1, LANE)), full((1, LANE)),
                  full((NODES_L2, LANE)), full((1, LANE)),
                  full((NODES_L3, LANE)), full((1, LANE))],
        out_specs=out_spec,
        compiler_params=pltpu.CompilerParams(
            dimension_semantics=("parallel",),               # megacore sharding on v7x
        ),
    )(xp, w1p, b1p, w2p, b2p, w3p, b3p, w4p, b4p)

    return out_padded[:B, :NUM_CLASSES]


def init_linear(key, fan_in, fan_out):
    """Deterministic init mimicking PyTorch nn.Linear default (uniform +/- 1/sqrt(fan_in)).
    Returns weight already transposed to (fan_in, fan_out) and bias as (1, fan_out)."""
    kw, kb = jax.random.split(key)
    bound = 1.0 / jnp.sqrt(fan_in)
    w = jax.random.uniform(kw, (fan_in, fan_out), jnp.float32, -bound, bound)
    b = jax.random.uniform(kb, (1, fan_out), jnp.float32, -bound, bound)
    return w, b


def reference_forward(x, params):
    """Plain JAX reference matching the kernel's bf16-matmul / f32-accumulate numerics."""
    def mm(a, w):
        return jnp.dot(a.astype(jnp.bfloat16), w.astype(jnp.bfloat16),
                       preferred_element_type=jnp.float32)
    h = x
    for name in ("l1", "l2", "l3"):
        w, b = params[name]
        h = jnp.maximum(mm(h, w) + b, 0.0)
    w, b = params["l4"]
    logits = mm(h, w) + b
    return jax.nn.softmax(logits, axis=1)


if __name__ == "__main__":
    key = jax.random.PRNGKey(0)
    kx, k1, k2, k3, k4 = jax.random.split(key, 5)

    x = jax.random.normal(kx, (BATCH, INPUT_DIM), jnp.float32)

    params = {
        "l1": init_linear(k1, INPUT_DIM, NODES_L1),
        "l2": init_linear(k2, NODES_L1, NODES_L2),
        "l3": init_linear(k3, NODES_L2, NODES_L3),
        "l4": init_linear(k4, NODES_L3, NUM_CLASSES),
    }

    out = sae_forward(x, params)
    out = jax.block_until_ready(out)

    ref = reference_forward(x, params)
    assert out.shape == (BATCH, NUM_CLASSES)
    # bf16 matmul inputs + approx reciprocal -> loose-but-tight-enough tolerances
    assert jnp.allclose(out, ref, atol=1e-2, rtol=0.0)
    # rows of the softmax must sum to ~1 (approx reciprocal introduces tiny error)
    assert jnp.allclose(jnp.sum(out, axis=1), jnp.ones((BATCH,)), atol=5e-3)

    print("KERNEL_OK")
</pallas_src>

<mosaic_0001>
module attributes {stable_mosaic.version = 11 : i64} {
  func.func @sae_kernel(%arg0: i32, %arg1: memref<256x32xf32, #tpu.memory_space<vmem>>, %arg2: memref<32x128xbf16, #tpu.memory_space<vmem>>, %arg3: memref<1x128xf32, #tpu.memory_space<vmem>>, %arg4: memref<64x128xbf16, #tpu.memory_space<vmem>>, %arg5: memref<1x128xf32, #tpu.memory_space<vmem>>, %arg6: memref<32x128xbf16, #tpu.memory_space<vmem>>, %arg7: memref<1x128xf32, #tpu.memory_space<vmem>>, %arg8: memref<16x128xbf16, #tpu.memory_space<vmem>>, %arg9: memref<1x128xf32, #tpu.memory_space<vmem>>, %arg10: memref<256x8xf32, #tpu.memory_space<vmem>>) attributes {dimension_semantics = [#tpu.dimension_semantics<parallel>], iteration_bounds = array<i64: 1>, scalar_prefetch = 0 : i64, scratch_operands = 0 : i64, tpu.core_type = #tpu.core_type<tc>, window_params = [{transform_indices = @transform_0, window_bounds = array<i64: 256, 32>}, {pipeline_mode = #tpu.pipeline_mode<synchronous>, transform_indices = @transform_1, window_bounds = array<i64: 32, 128>}, {pipeline_mode = #tpu.pipeline_mode<synchronous>, transform_indices = @transform_2, window_bounds = array<i64: 1, 128>}, {pipeline_mode = #tpu.pipeline_mode<synchronous>, transform_indices = @transform_3, window_bounds = array<i64: 64, 128>}, {pipeline_mode = #tpu.pipeline_mode<synchronous>, transform_indices = @transform_4, window_bounds = array<i64: 1, 128>}, {pipeline_mode = #tpu.pipeline_mode<synchronous>, transform_indices = @transform_5, window_bounds = array<i64: 32, 128>}, {pipeline_mode = #tpu.pipeline_mode<synchronous>, transform_indices = @transform_6, window_bounds = array<i64: 1, 128>}, {pipeline_mode = #tpu.pipeline_mode<synchronous>, transform_indices = @transform_7, window_bounds = array<i64: 16, 128>}, {pipeline_mode = #tpu.pipeline_mode<synchronous>, transform_indices = @transform_8, window_bounds = array<i64: 1, 128>}, {transform_indices = @transform_9, window_bounds = array<i64: 256, 8>}]} {
    %c0 = arith.constant 0 : index
    %c0_0 = arith.constant 0 : index
    %0 = vector.load %arg1[%c0, %c0_0] : memref<256x32xf32, #tpu.memory_space<vmem>>, vector<256x32xf32>
    %1 = arith.truncf %0 : vector<256x32xf32> to vector<256x32xbf16>
    %c0_1 = arith.constant 0 : index
    %c0_2 = arith.constant 0 : index
    %2 = vector.load %arg2[%c0_1, %c0_2] : memref<32x128xbf16, #tpu.memory_space<vmem>>, vector<32x128xbf16>
    %cst = arith.constant dense<0.000000e+00> : vector<256x128xf32>
    %3 = tpu.matmul %1, %2, %cst {dimension_numbers = #tpu.dot_dimension_numbers<[1], [0], [0], [1], [0, 0, 1, 1], [], []>} : vector<256x32xbf16>, vector<32x128xbf16>, vector<256x128xf32> -> vector<256x128xf32>
    %c0_3 = arith.constant 0 : index
    %c0_4 = arith.constant 0 : index
    %4 = vector.load %arg3[%c0_3, %c0_4] : memref<1x128xf32, #tpu.memory_space<vmem>>, vector<1x128xf32>
    %5 = vector.broadcast %4 : vector<1x128xf32> to vector<256x128xf32>
    %6 = arith.addf %3, %5 : vector<256x128xf32>
    %cst_5 = arith.constant 0.000000e+00 : f32
    %7 = vector.broadcast %cst_5 : f32 to vector<256x128xf32>
    %8 = arith.maximumf %6, %7 : vector<256x128xf32>
    %9 = arith.truncf %8 : vector<256x128xf32> to vector<256x128xbf16>
    %10 = vector.extract_strided_slice %9 {offsets = [0, 0], sizes = [256, 64], strides = [1, 1]} : vector<256x128xbf16> to vector<256x64xbf16>
    %c0_6 = arith.constant 0 : index
    %c0_7 = arith.constant 0 : index
    %11 = vector.load %arg4[%c0_6, %c0_7] : memref<64x128xbf16, #tpu.memory_space<vmem>>, vector<64x128xbf16>
    %cst_8 = arith.constant dense<0.000000e+00> : vector<256x128xf32>
    %12 = tpu.matmul %10, %11, %cst_8 {dimension_numbers = #tpu.dot_dimension_numbers<[1], [0], [0], [1], [0, 0, 1, 1], [], []>} : vector<256x64xbf16>, vector<64x128xbf16>, vector<256x128xf32> -> vector<256x128xf32>
    %c0_9 = arith.constant 0 : index
    %c0_10 = arith.constant 0 : index
    %13 = vector.load %arg5[%c0_9, %c0_10] : memref<1x128xf32, #tpu.memory_space<vmem>>, vector<1x128xf32>
    %14 = vector.broadcast %13 : vector<1x128xf32> to vector<256x128xf32>
    %15 = arith.addf %12, %14 : vector<256x128xf32>
    %cst_11 = arith.constant 0.000000e+00 : f32
    %16 = vector.broadcast %cst_11 : f32 to vector<256x128xf32>
    %17 = arith.maximumf %15, %16 : vector<256x128xf32>
    %18 = arith.truncf %17 : vector<256x128xf32> to vector<256x128xbf16>
    %19 = vector.extract_strided_slice %18 {offsets = [0, 0], sizes = [256, 32], strides = [1, 1]} : vector<256x128xbf16> to vector<256x32xbf16>
    %c0_12 = arith.constant 0 : index
    %c0_13 = arith.constant 0 : index
    %20 = vector.load %arg6[%c0_12, %c0_13] : memref<32x128xbf16, #tpu.memory_space<vmem>>, vector<32x128xbf16>
    %cst_14 = arith.constant dense<0.000000e+00> : vector<256x128xf32>
    %21 = tpu.matmul %19, %20, %cst_14 {dimension_numbers = #tpu.dot_dimension_numbers<[1], [0], [0], [1], [0, 0, 1, 1], [], []>} : vector<256x32xbf16>, vector<32x128xbf16>, vector<256x128xf32> -> vector<256x128xf32>
    %c0_15 = arith.constant 0 : index
    %c0_16 = arith.constant 0 : index
    %22 = vector.load %arg7[%c0_15, %c0_16] : memref<1x128xf32, #tpu.memory_space<vmem>>, vector<1x128xf32>
    %23 = vector.broadcast %22 : vector<1x128xf32> to vector<256x128xf32>
    %24 = arith.addf %21, %23 : vector<256x128xf32>
    %cst_17 = arith.constant 0.000000e+00 : f32
    %25 = vector.broadcast %cst_17 : f32 to vector<256x128xf32>
    %26 = arith.maximumf %24, %25 : vector<256x128xf32>
    %27 = arith.truncf %26 : vector<256x128xf32> to vector<256x128xbf16>
    %28 = vector.extract_strided_slice %27 {offsets = [0, 0], sizes = [256, 16], strides = [1, 1]} : vector<256x128xbf16> to vector<256x16xbf16>
    %c0_18 = arith.constant 0 : index
    %c0_19 = arith.constant 0 : index
    %29 = vector.load %arg8[%c0_18, %c0_19] : memref<16x128xbf16, #tpu.memory_space<vmem>>, vector<16x128xbf16>
    %cst_20 = arith.constant dense<0.000000e+00> : vector<256x128xf32>
    %30 = tpu.matmul %28, %29, %cst_20 {dimension_numbers = #tpu.dot_dimension_numbers<[1], [0], [0], [1], [0, 0, 1, 1], [], []>} : vector<256x16xbf16>, vector<16x128xbf16>, vector<256x128xf32> -> vector<256x128xf32>
    %c0_21 = arith.constant 0 : index
    %c0_22 = arith.constant 0 : index
    %31 = vector.load %arg9[%c0_21, %c0_22] : memref<1x128xf32, #tpu.memory_space<vmem>>, vector<1x128xf32>
    %32 = vector.broadcast %31 : vector<1x128xf32> to vector<256x128xf32>
    %33 = arith.addf %30, %32 : vector<256x128xf32>
    %34 = vector.extract_strided_slice %33 {offsets = [0, 0], sizes = [256, 8], strides = [1, 1]} : vector<256x128xf32> to vector<256x8xf32>
    %cst_23 = arith.constant dense<0xFF800000> : vector<256xf32>
    %35 = vector.multi_reduction <maximumf>, %34, %cst_23 [1] : vector<256x8xf32> to vector<256xf32>
    %36 = vector.shape_cast %35 : vector<256xf32> to vector<256x1xf32>
    %37 = vector.broadcast %36 : vector<256x1xf32> to vector<256x8xf32>
    %38 = arith.subf %34, %37 : vector<256x8xf32>
    %39 = math.exp %38 : vector<256x8xf32>
    %cst_24 = arith.constant dense<0.000000e+00> : vector<256xf32>
    %40 = vector.multi_reduction <add>, %39, %cst_24 [1] : vector<256x8xf32> to vector<256xf32>
    %41 = vector.shape_cast %40 : vector<256xf32> to vector<256x1xf32>
    %42 = tpu.reciprocal %41 {approx = true} : vector<256x1xf32> -> vector<256x1xf32>
    %43 = vector.broadcast %42 : vector<256x1xf32> to vector<256x8xf32>
    %44 = arith.mulf %39, %43 : vector<256x8xf32>
    %c0_25 = arith.constant 0 : index
    %c0_26 = arith.constant 0 : index
    %45 = vector.load %arg10[%c0_25, %c0_26] : memref<256x8xf32, #tpu.memory_space<vmem>>, vector<256x8xf32>
    tpu.vector_store %arg10[%c0_25, %c0_26], %44 {strides = array<i32>} : memref<256x8xf32, #tpu.memory_space<vmem>>, vector<256x8xf32>,
    return
  }
  func.func @transform_0(%arg0: i32) -> (i32, i32) {
    %c0_i32 = arith.constant 0 : i32
    %c0_i32_0 = arith.constant 0 : i32
    return %arg0, %c0_i32 : i32, i32
  }
  func.func @transform_1(%arg0: i32) -> (i32, i32) {
    %c0_i32 = arith.constant 0 : i32
    %c0_i32_0 = arith.constant 0 : i32
    %c0_i32_1 = arith.constant 0 : i32
    return %c0_i32, %c0_i32_0 : i32, i32
  }
  func.func @transform_2(%arg0: i32) -> (i32, i32) {
    %c0_i32 = arith.constant 0 : i32
    %c0_i32_0 = arith.constant 0 : i32
    %c0_i32_1 = arith.constant 0 : i32
    return %c0_i32, %c0_i32_0 : i32, i32
  }
  func.func @transform_3(%arg0: i32) -> (i32, i32) {
    %c0_i32 = arith.constant 0 : i32
    %c0_i32_0 = arith.constant 0 : i32
    %c0_i32_1 = arith.constant 0 : i32
    return %c0_i32, %c0_i32_0 : i32, i32
  }
  func.func @transform_4(%arg0: i32) -> (i32, i32) {
    %c0_i32 = arith.constant 0 : i32
    %c0_i32_0 = arith.constant 0 : i32
    %c0_i32_1 = arith.constant 0 : i32
    return %c0_i32, %c0_i32_0 : i32, i32
  }
  func.func @transform_5(%arg0: i32) -> (i32, i32) {
    %c0_i32 = arith.constant 0 : i32
    %c0_i32_0 = arith.constant 0 : i32
    %c0_i32_1 = arith.constant 0 : i32
    return %c0_i32, %c0_i32_0 : i32, i32
  }
  func.func @transform_6(%arg0: i32) -> (i32, i32) {
    %c0_i32 = arith.constant 0 : i32
    %c0_i32_0 = arith.constant 0 : i32
    %c0_i32_1 = arith.constant 0 : i32
    return %c0_i32, %c0_i32_0 : i32, i32
  }
  func.func @transform_7(%arg0: i32) -> (i32, i32) {
    %c0_i32 = arith.constant 0 : i32
    %c0_i32_0 = arith.constant 0 : i32
    %c0_i32_1 = arith.constant 0 : i32
    return %c0_i32, %c0_i32_0 : i32, i32
  }
  func.func @transform_8(%arg0: i32) -> (i32, i32) {
    %c0_i32 = arith.constant 0 : i32
    %c0_i32_0 = arith.constant 0 : i32
    %c0_i32_1 = arith.constant 0 : i32
    return %c0_i32, %c0_i32_0 : i32, i32
  }
  func.func @transform_9(%arg0: i32) -> (i32, i32) {
    %c0_i32 = arith.constant 0 : i32
    %c0_i32_0 = arith.constant 0 : i32
    return %arg0, %c0_i32 : i32, i32
  }
}

</mosaic_0001>

<bundles_post_ra>
// kernel: tpu_custom_call.1
= control target key start
LH: loop header
LB: loop body
LE: loop exit
PB: predicated region body
PF: predicated region fallthrough
CT: control target
= control target key end

     0   :  { %vm101_vm0 = vcmask 261120   ;;  %vm419_vm1 = vcmask 523264   ;;  %vm1014_vm2 = vcmask 130048   ;;  %vm1152_vm3 = vcmask 64512   ;;  %s2615_s1 = inlined_call_operand.vmem [shape: bf16[32,128], index: 1, kind: input, shape index: {}]   ;;  %s2616_s0 = inlined_call_operand.vmem [shape: f32[256,32], index: 0, kind: input, shape index: {}]   ;;  %s2617_s2 = inlined_call_operand.vmem [shape: f32[1,128], index: 2, kind: input, shape index: {}]   ;;  %s2618_s3 = inlined_call_operand.vmem [shape: bf16[64,128], index: 3, kind: input, shape index: {}]   ;;  %s2619_s4 = inlined_call_operand.vmem [shape: f32[1,128], index: 4, kind: input, shape index: {}]   ;;  %s2620_s5 = inlined_call_operand.vmem [shape: bf16[32,128], index: 5, kind: input, shape index: {}]   ;;  %s2621_s6 = inlined_call_operand.vmem [shape: f32[1,128], index: 6, kind: input, shape index: {}]   ;;  %s2622_s7 = inlined_call_operand.vmem [shape: bf16[16,128], index: 7, kind: input, shape index: {}]   ;;  %s2623_s8 = inlined_call_operand.vmem [shape: f32[1,128], index: 8, kind: input, shape index: {}]   ;;  %s2624_s9 = inlined_call_operand.vmem [shape: f32[256,8], index: 9, kind: output, shape index: {}]  }
   0x1   :  { %v1642_v0 = vld [vmem:[%s2615_s1 + $0x8] sm:$0xff]  ;;  %v1641_v1 = vld [vmem:[%s2615_s1] sm:$0xff]  ;;  %v35_v5 = vld [vmem:[%s2616_s0 + $0x10] sm:$0xff] }
   0x2   :  { %156 = vmatpush.bf16.msra.mxu0 %v1642_v0  ;;  %v33_v2 = vld [vmem:[%s2616_s0] sm:$0xff]  ;;  %v34_v3 = vld [vmem:[%s2616_s0 + $0x8] sm:$0xff]  ;;  %v36_v6 = vld [vmem:[%s2616_s0 + $0x18] sm:$0xff] }
   0x3   :  { %v65_v4 = vpack.c.bf16 %v34_v3, %v33_v2  ;;  %v66_v7 = vpack.c.bf16 %v36_v6, %v35_v5  ;;  %v37_v8 = vld [vmem:[%s2616_s0 + $0x20] sm:$0xff]  ;;  %v38_v9 = vld [vmem:[%s2616_s0 + $0x28] sm:$0xff]  ;;  %v39_v11 = vld [vmem:[%s2616_s0 + $0x30] sm:$0xff] }
   0x4   :  { %v67_v10 = vpack.c.bf16 %v38_v9, %v37_v8  ;;  %v40_v12 = vld [vmem:[%s2616_s0 + $0x38] sm:$0xff]  ;;  %v41_v14 = vld [vmem:[%s2616_s0 + $0x40] sm:$0xff]  ;;  %v42_v15 = vld [vmem:[%s2616_s0 + $0x48] sm:$0xff] }
   0x5   :  { %v68_v13 = vpack.c.bf16 %v40_v12, %v39_v11  ;;  %v69_v16 = vpack.c.bf16 %v42_v15, %v41_v14  ;;  %v43_v17 = vld [vmem:[%s2616_s0 + $0x50] sm:$0xff]  ;;  %v44_v18 = vld [vmem:[%s2616_s0 + $0x58] sm:$0xff]  ;;  %v45_v20 = vld [vmem:[%s2616_s0 + $0x60] sm:$0xff] }
   0x6   :  { %157 = vmatpush.bf16.msra.mxu0 %v1641_v1  ;;  %v70_v19 = vpack.c.bf16 %v44_v18, %v43_v17  ;;  %v46_v21 = vld [vmem:[%s2616_s0 + $0x68] sm:$0xff]  ;;  %v1646_v23 = vld [vmem:[%s2618_s3 + $0x18] sm:$0xff]  ;;  %v1645_v24 = vld [vmem:[%s2618_s3 + $0x10] sm:$0xff] }
   0x7   :  { %v71_v22 = vpack.c.bf16 %v46_v21, %v45_v20  ;;  %472 = vmatpush.bf16.msra.mxu1 %v1646_v23  ;;  %v1644_v25 = vld [vmem:[%s2618_s3 + $0x8] sm:$0xff]  ;;  %v47_v26 = vld [vmem:[%s2616_s0 + $0x70] sm:$0xff]  ;;  %v48_v27 = vld [vmem:[%s2616_s0 + $0x78] sm:$0xff] }
   0x8   :  { %v1643_v28 = vld [vmem:[%s2618_s3] sm:$0xff]  ;;  %v72_v29 = vpack.c.bf16 %v48_v27, %v47_v26  ;;  %v50_v31 = vld [vmem:[%s2616_s0 + $0x88] sm:$0xff]  ;;  %v51_v41 = vld [vmem:[%s2616_s0 + $0x90] sm:$0xff] }
   0x9   :  { %1549 = vmatmul.msk.bf16.vlgmr.msra.gmra.mxu0 %vm101_vm0, %v65_v4  ;;  %v49_v30 = vld [vmem:[%s2616_s0 + $0x80] sm:$0xff]  ;;  %v52_v42 = vld [vmem:[%s2616_s0 + $0x98] sm:$0xff]  ;;  %v54_v56 = vld [vmem:[%s2616_s0 + $0xa8] sm:$0xff] }
   0xa   :  { %v1915_v32 = vld [vmem:[%s2617_s2] ss:$0 sm:$0xff]  ;;  %v73_v33 = vpack.c.bf16 %v50_v31, %v49_v30  ;;  %v74_v46 = vpack.c.bf16 %v52_v42, %v51_v41  ;;  %v55_v5 = vld [vmem:[%s2616_s0 + $0xb0] sm:$0xff]  ;;  %v56_v6 = vld [vmem:[%s2616_s0 + $0xb8] sm:$0xff] }
   0xb   :  { %473 = vmatpush.bf16.msra.mxu1 %v1645_v24  ;;  %v53_v55 = vld [vmem:[%s2616_s0 + $0xa0] sm:$0xff]  ;;  %v58_v20 = vld [vmem:[%s2616_s0 + $0xc8] sm:$0xff] }
   0xc   :  { %v75_v60 = vpack.c.bf16 %v54_v56, %v53_v55 }
   0xf   :  { %474 = vmatpush.bf16.msra.mxu1 %v1644_v25 }
  0x13   :  { %475 = vmatpush.bf16.msra.mxu1 %v1643_v28 }
  0x19   :  { %1550 = vmatmul.msk.bf16.gmra.mxu0 %vm101_vm0, %v66_v7 }
  0x29   :  { %1551 = vmatmul.msk.bf16.gmra.mxu0 %vm101_vm0, %v67_v10  ;;  %v76_v10 = vpack.c.bf16 %v56_v6, %v55_v5 }
  0x39   :  { %1552 = vmatmul.msk.bf16.gmra.mxu0 %vm101_vm0, %v68_v13 }
  0x49   :  { %1553 = vmatmul.msk.bf16.gmra.mxu0 %vm101_vm0, %v69_v16 }
  0x59   :  { %1554 = vmatmul.msk.bf16.gmra.mxu0 %vm101_vm0, %v70_v19  ;;  %v57_v19 = vld [vmem:[%s2616_s0 + $0xc0] sm:$0xff] }
  0x5a   :  { %v77_v24 = vpack.c.bf16 %v58_v20, %v57_v19 }
  0x69   :  { %1555 = vmatmul.msk.bf16.gmra.mxu0 %vm101_vm0, %v71_v22 }
  0x79   :  { %1556 = vmatmul.msk.bf16.gmra.mxu0 %vm101_vm0, %v72_v29 }
  0x86   :  { %v159_v34 = vpop.f32.mrf.mxu0 }
  0x87   :  { %v160_v35 = vadd.f32 %v1915_v32, %v159_v34  ;;  %v59_v34 = vld [vmem:[%s2616_s0 + $0xd0] sm:$0xff] }
  0x89   :  { %1557 = vmatmul.msk.bf16.gmra.mxu0 %vm101_vm0, %v73_v33  ;;  %v239_v36 = vmax.f32 %v160_v35, 0.0  ;;  %v60_v35 = vld [vmem:[%s2616_s0 + $0xd8] sm:$0xff] }
  0x8b   :  { %v271_v39 = vpack.c.bf16 %v239_v36, %v239_v36 }
  0x8d   :  { %v347_v44 = vunpack.c.l.b16 %v271_v39  ;;  %v78_v39 = vpack.c.bf16 %v60_v35, %v59_v34 }
  0x8e   :  { %v161_v37 = vpop.f32.mrf.mxu0 }
  0x8f   :  { %v162_v38 = vadd.f32 %v1915_v32, %v161_v37 }
  0x91   :  { %v240_v40 = vmax.f32 %v162_v38, 0.0 }
  0x93   :  { %v272_v43 = vpack.c.bf16 %v240_v40, %v240_v40 }
  0x95   :  { %v348_v45 = vunpack.c.l.b16 %v272_v43 }
  0x96   :  { %v164_v47 = vpop.f32.mrf.mxu0 }
  0x97   :  { %v379_v48 = vpack.c.b16 %v348_v45, %v347_v44  ;;  %v165_v49 = vadd.f32 %v1915_v32, %v164_v47 }
  0x99   :  { %1558 = vmatmul.msk.bf16.gmra.mxu0 %vm101_vm0, %v74_v46  ;;  %1581 = vmatmul.msk.bf16.vlgmr.msra.gmra.mxu1 %vm419_vm1, %v379_v48  ;;  %v241_v50 = vmax.f32 %v165_v49, 0.0  ;;  %v61_v48 = vld [vmem:[%s2616_s0 + $0xe0] sm:$0xff]  ;;  %v62_v49 = vld [vmem:[%s2616_s0 + $0xe8] sm:$0xff] }
  0x9b   :  { %v273_v53 = vpack.c.bf16 %v241_v50, %v241_v50 }
  0x9d   :  { %v349_v58 = vunpack.c.l.b16 %v273_v53  ;;  %v79_v53 = vpack.c.bf16 %v62_v49, %v61_v48 }
  0x9e   :  { %v166_v51 = vpop.f32.mrf.mxu0 }
  0x9f   :  { %v167_v52 = vadd.f32 %v1915_v32, %v166_v51 }
  0xa1   :  { %v242_v54 = vmax.f32 %v167_v52, 0.0 }
  0xa3   :  { %v274_v57 = vpack.c.bf16 %v242_v54, %v242_v54 }
  0xa5   :  { %v350_v59 = vunpack.c.l.b16 %v274_v57 }
  0xa6   :  { %v169_v61 = vpop.f32.mrf.mxu0 }
  0xa7   :  { %v380_v62 = vpack.c.b16 %v350_v59, %v349_v58  ;;  %v170_v63 = vadd.f32 %v1915_v32, %v169_v61 }
  0xa9   :  { %1559 = vmatmul.msk.bf16.gmra.mxu0 %vm101_vm0, %v75_v60  ;;  %1582 = vmatmul.msk.bf16.gmra.mxu1 %vm419_vm1, %v380_v62  ;;  %v243_v0 = vmax.f32 %v170_v63, 0.0  ;;  %v63_v62 = vld [vmem:[%s2616_s0 + $0xf0] sm:$0xff]  ;;  %v64_v63 = vld [vmem:[%s2616_s0 + $0xf8] sm:$0xff] }
  0xab   :  { %v275_v3 = vpack.c.bf16 %v243_v0, %v243_v0 }
  0xad   :  { %v351_v8 = vunpack.c.l.b16 %v275_v3  ;;  %v80_v3 = vpack.c.bf16 %v64_v63, %v63_v62 }
  0xae   :  { %v171_v1 = vpop.f32.mrf.mxu0 }
  0xaf   :  { %v172_v2 = vadd.f32 %v1915_v32, %v171_v1 }
  0xb1   :  { %v244_v4 = vmax.f32 %v172_v2, 0.0 }
  0xb3   :  { %v276_v7 = vpack.c.bf16 %v244_v4, %v244_v4 }
  0xb5   :  { %v352_v9 = vunpack.c.l.b16 %v276_v7 }
  0xb6   :  { %v174_v11 = vpop.f32.mrf.mxu0 }
  0xb7   :  { %v381_v12 = vpack.c.b16 %v352_v9, %v351_v8  ;;  %v175_v13 = vadd.f32 %v1915_v32, %v174_v11 }
  0xb9   :  { %1560 = vmatmul.msk.bf16.gmra.mxu0 %vm101_vm0, %v76_v10  ;;  %1583 = vmatmul.msk.bf16.gmra.mxu1 %vm419_vm1, %v381_v12  ;;  %v245_v14 = vmax.f32 %v175_v13, 0.0  ;;  %v1648_v10 = vld [vmem:[%s2620_s5 + $0x8] sm:$0xff] }
  0xba   :  { %775 = vmatpush.bf16.msra.mxu2 %v1648_v10 }
  0xbb   :  { %v277_v17 = vpack.c.bf16 %v245_v14, %v245_v14  ;;  %v1647_v14 = vld [vmem:[%s2620_s5] sm:$0xff] }
  0xbd   :  { %v353_v22 = vunpack.c.l.b16 %v277_v17 }
  0xbe   :  { %v176_v15 = vpop.f32.mrf.mxu0  ;;  %776 = vmatpush.bf16.msra.mxu2 %v1647_v14 }
  0xbf   :  { %v177_v16 = vadd.f32 %v1915_v32, %v176_v15 }
  0xc1   :  { %v246_v18 = vmax.f32 %v177_v16, 0.0 }
  0xc3   :  { %v278_v21 = vpack.c.bf16 %v246_v18, %v246_v18 }
  0xc5   :  { %v354_v23 = vunpack.c.l.b16 %v278_v21 }
  0xc6   :  { %v179_v25 = vpop.f32.mrf.mxu0 }
  0xc7   :  { %v382_v26 = vpack.c.b16 %v354_v23, %v353_v22  ;;  %v180_v27 = vadd.f32 %v1915_v32, %v179_v25 }
  0xc9   :  { %1561 = vmatmul.msk.bf16.gmra.mxu0 %vm101_vm0, %v77_v24  ;;  %1584 = vmatmul.msk.bf16.gmra.mxu1 %vm419_vm1, %v382_v26  ;;  %v247_v28 = vmax.f32 %v180_v27, 0.0 }
  0xcb   :  { %v279_v31 = vpack.c.bf16 %v247_v28, %v247_v28  ;;  %v2002_v28 = vld [vmem:[%s2619_s4] ss:$0 sm:$0xff] }
  0xcd   :  { %v355_v37 = vunpack.c.l.b16 %v279_v31 }
  0xce   :  { %v181_v29 = vpop.f32.mrf.mxu0 }
  0xcf   :  { %v182_v30 = vadd.f32 %v1915_v32, %v181_v29 }
  0xd1   :  { %v248_v33 = vmax.f32 %v182_v30, 0.0 }
  0xd3   :  { %v280_v36 = vpack.c.bf16 %v248_v33, %v248_v33 }
  0xd5   :  { %v356_v38 = vunpack.c.l.b16 %v280_v36 }
  0xd6   :  { %v184_v40 = vpop.f32.mrf.mxu0 }
  0xd7   :  { %v383_v41 = vpack.c.b16 %v356_v38, %v355_v37  ;;  %v185_v42 = vadd.f32 %v1915_v32, %v184_v40 }
  0xd9   :  { %1562 = vmatmul.msk.bf16.gmra.mxu0 %vm101_vm0, %v78_v39  ;;  %1585 = vmatmul.msk.bf16.gmra.mxu1 %vm419_vm1, %v383_v41  ;;  %v249_v43 = vmax.f32 %v185_v42, 0.0 }
  0xdb   :  { %v281_v46 = vpack.c.bf16 %v249_v43, %v249_v43 }
  0xdd   :  { %v357_v51 = vunpack.c.l.b16 %v281_v46 }
  0xde   :  { %v186_v44 = vpop.f32.mrf.mxu0 }
  0xdf   :  { %v187_v45 = vadd.f32 %v1915_v32, %v186_v44 }
  0xe1   :  { %v250_v47 = vmax.f32 %v187_v45, 0.0 }
  0xe3   :  { %v282_v50 = vpack.c.bf16 %v250_v47, %v250_v47 }
  0xe5   :  { %v358_v52 = vunpack.c.l.b16 %v282_v50 }
  0xe6   :  { %v189_v54 = vpop.f32.mrf.mxu0 }
  0xe7   :  { %v384_v55 = vpack.c.b16 %v358_v52, %v357_v51  ;;  %v190_v56 = vadd.f32 %v1915_v32, %v189_v54 }
  0xe9   :  { %1563 = vmatmul.msk.bf16.gmra.mxu0 %vm101_vm0, %v79_v53  ;;  %1586 = vmatmul.msk.bf16.gmra.mxu1 %vm419_vm1, %v384_v55  ;;  %v251_v57 = vmax.f32 %v190_v56, 0.0 }
  0xeb   :  { %v283_v60 = vpack.c.bf16 %v251_v57, %v251_v57 }
  0xed   :  { %v359_v1 = vunpack.c.l.b16 %v283_v60 }
  0xee   :  { %v191_v58 = vpop.f32.mrf.mxu0 }
  0xef   :  { %v192_v59 = vadd.f32 %v1915_v32, %v191_v58 }
  0xf1   :  { %v252_v61 = vmax.f32 %v192_v59, 0.0 }
  0xf3   :  { %v284_v0 = vpack.c.bf16 %v252_v61, %v252_v61 }
  0xf5   :  { %v360_v2 = vunpack.c.l.b16 %v284_v0 }
  0xf6   :  { %v194_v4 = vpop.f32.mrf.mxu0 }
  0xf7   :  { %v385_v5 = vpack.c.b16 %v360_v2, %v359_v1  ;;  %v195_v6 = vadd.f32 %v1915_v32, %v194_v4 }
  0xf9   :  { %1564 = vmatmul.msk.bf16.gmra.mxu0 %vm101_vm0, %v80_v3  ;;  %1587 = vmatmul.msk.bf16.gmra.mxu1 %vm419_vm1, %v385_v5  ;;  %v253_v7 = vmax.f32 %v195_v6, 0.0 }
  0xfb   :  { %v285_v11 = vpack.c.bf16 %v253_v7, %v253_v7 }
  0xfd   :  { %v361_v15 = vunpack.c.l.b16 %v285_v11 }
  0xfe   :  { %v196_v8 = vpop.f32.mrf.mxu0 }
  0xff   :  { %v197_v9 = vadd.f32 %v1915_v32, %v196_v8 }
 0x101   :  { %v254_v12 = vmax.f32 %v197_v9, 0.0 }
 0x103   :  { %v286_v13 = vpack.c.bf16 %v254_v12, %v254_v12 }
 0x105   :  { %v362_v16 = vunpack.c.l.b16 %v286_v13 }
 0x106   :  { %v199_v17 = vpop.f32.mrf.mxu0 }
 0x107   :  { %v386_v18 = vpack.c.b16 %v362_v16, %v361_v15  ;;  %v200_v19 = vadd.f32 %v1915_v32, %v199_v17 }
 0x109   :  { %1588 = vmatmul.msk.bf16.gmra.mxu1 %vm419_vm1, %v386_v18  ;;  %v255_v20 = vmax.f32 %v200_v19, 0.0 }
 0x10b   :  { %v287_v23 = vpack.c.bf16 %v255_v20, %v255_v20 }
 0x10d   :  { %v363_v26 = vunpack.c.l.b16 %v287_v23 }
 0x10e   :  { %v201_v21 = vpop.f32.mrf.mxu0 }
 0x10f   :  { %v202_v22 = vadd.f32 %v1915_v32, %v201_v21 }
 0x111   :  { %v256_v24 = vmax.f32 %v202_v22, 0.0 }
 0x113   :  { %v288_v25 = vpack.c.bf16 %v256_v24, %v256_v24 }
 0x115   :  { %v364_v27 = vunpack.c.l.b16 %v288_v25 }
 0x116   :  { %v204_v29 = vpop.f32.mrf.mxu0  ;;  %v477_v30 = vpop.f32.mrf.mxu1 }
 0x117   :  { %v387_v31 = vpack.c.b16 %v364_v27, %v363_v26  ;;  %v205_v33 = vadd.f32 %v1915_v32, %v204_v29  ;;  %v478_v34 = vadd.f32 %v2002_v28, %v477_v30 }
 0x119   :  { %1589 = vmatmul.msk.bf16.gmra.mxu1 %vm419_vm1, %v387_v31  ;;  %v257_v35 = vmax.f32 %v205_v33, 0.0  ;;  %v557_v36 = vmax.f32 %v478_v34, 0.0 }
 0x11b   :  { %v289_v41 = vpack.c.bf16 %v257_v35, %v257_v35  ;;  %v589_v42 = vpack.c.bf16 %v557_v36, %v557_v36 }
 0x11d   :  { %v365_v47 = vunpack.c.l.b16 %v289_v41  ;;  %v661_v48 = vunpack.c.l.b16 %v589_v42 }
 0x11e   :  { %v206_v37 = vpop.f32.mrf.mxu0  ;;  %v479_v38 = vpop.f32.mrf.mxu1 }
 0x11f   :  { %v207_v39 = vadd.f32 %v1915_v32, %v206_v37  ;;  %v480_v40 = vadd.f32 %v2002_v28, %v479_v38 }
 0x121   :  { %v258_v43 = vmax.f32 %v207_v39, 0.0  ;;  %v558_v44 = vmax.f32 %v480_v40, 0.0 }
 0x123   :  { %v290_v45 = vpack.c.bf16 %v258_v43, %v258_v43  ;;  %v590_v46 = vpack.c.bf16 %v558_v44, %v558_v44 }
 0x125   :  { %v366_v49 = vunpack.c.l.b16 %v290_v45  ;;  %v662_v50 = vunpack.c.l.b16 %v590_v46 }
 0x126   :  { %v209_v51 = vpop.f32.mrf.mxu0  ;;  %v482_v52 = vpop.f32.mrf.mxu1 }
 0x127   :  { %v388_v53 = vpack.c.b16 %v366_v49, %v365_v47  ;;  %v693_v54 = vpack.c.b16 %v662_v50, %v661_v48  ;;  %v210_v55 = vadd.f32 %v1915_v32, %v209_v51  ;;  %v483_v56 = vadd.f32 %v2002_v28, %v482_v52 }
 0x129   :  { %1590 = vmatmul.msk.bf16.gmra.mxu1 %vm419_vm1, %v388_v53  ;;  %1605 = vmatmul.msk.bf16.vlgmr.msra.gmra.mxu2 %vm101_vm0, %v693_v54  ;;  %v259_v57 = vmax.f32 %v210_v55, 0.0  ;;  %v559_v58 = vmax.f32 %v483_v56, 0.0 }
 0x12b   :  { %v291_v63 = vpack.c.bf16 %v259_v57, %v259_v57  ;;  %v591_v0 = vpack.c.bf16 %v559_v58, %v559_v58 }
 0x12d   :  { %v367_v5 = vunpack.c.l.b16 %v291_v63  ;;  %v663_v6 = vunpack.c.l.b16 %v591_v0 }
 0x12e   :  { %v211_v59 = vpop.f32.mrf.mxu0  ;;  %v484_v60 = vpop.f32.mrf.mxu1 }
 0x12f   :  { %v212_v61 = vadd.f32 %v1915_v32, %v211_v59  ;;  %v485_v62 = vadd.f32 %v2002_v28, %v484_v60 }
 0x131   :  { %v260_v1 = vmax.f32 %v212_v61, 0.0  ;;  %v560_v2 = vmax.f32 %v485_v62, 0.0 }
 0x133   :  { %v292_v3 = vpack.c.bf16 %v260_v1, %v260_v1  ;;  %v592_v4 = vpack.c.bf16 %v560_v2, %v560_v2 }
 0x135   :  { %v368_v7 = vunpack.c.l.b16 %v292_v3  ;;  %v664_v8 = vunpack.c.l.b16 %v592_v4 }
 0x136   :  { %v214_v9 = vpop.f32.mrf.mxu0  ;;  %v487_v10 = vpop.f32.mrf.mxu1 }
 0x137   :  { %v389_v11 = vpack.c.b16 %v368_v7, %v367_v5  ;;  %v694_v12 = vpack.c.b16 %v664_v8, %v663_v6  ;;  %v215_v13 = vadd.f32 %v1915_v32, %v214_v9  ;;  %v488_v14 = vadd.f32 %v2002_v28, %v487_v10 }
 0x139   :  { %1591 = vmatmul.msk.bf16.gmra.mxu1 %vm419_vm1, %v389_v11  ;;  %1606 = vmatmul.msk.bf16.gmra.mxu2 %vm101_vm0, %v694_v12  ;;  %v261_v15 = vmax.f32 %v215_v13, 0.0  ;;  %v561_v16 = vmax.f32 %v488_v14, 0.0 }
 0x13b   :  { %v293_v21 = vpack.c.bf16 %v261_v15, %v261_v15  ;;  %v593_v22 = vpack.c.bf16 %v561_v16, %v561_v16 }
 0x13d   :  { %v369_v27 = vunpack.c.l.b16 %v293_v21  ;;  %v665_v29 = vunpack.c.l.b16 %v593_v22 }
 0x13e   :  { %v216_v17 = vpop.f32.mrf.mxu0  ;;  %v489_v18 = vpop.f32.mrf.mxu1 }
 0x13f   :  { %v217_v19 = vadd.f32 %v1915_v32, %v216_v17  ;;  %v490_v20 = vadd.f32 %v2002_v28, %v489_v18 }
 0x141   :  { %v262_v23 = vmax.f32 %v217_v19, 0.0  ;;  %v562_v24 = vmax.f32 %v490_v20, 0.0 }
 0x143   :  { %v294_v25 = vpack.c.bf16 %v262_v23, %v262_v23  ;;  %v594_v26 = vpack.c.bf16 %v562_v24, %v562_v24 }
 0x145   :  { %v370_v30 = vunpack.c.l.b16 %v294_v25  ;;  %v666_v31 = vunpack.c.l.b16 %v594_v26 }
 0x146   :  { %v219_v33 = vpop.f32.mrf.mxu0  ;;  %v492_v34 = vpop.f32.mrf.mxu1 }
 0x147   :  { %v390_v35 = vpack.c.b16 %v370_v30, %v369_v27  ;;  %v695_v36 = vpack.c.b16 %v666_v31, %v665_v29  ;;  %v220_v37 = vadd.f32 %v1915_v32, %v219_v33  ;;  %v493_v38 = vadd.f32 %v2002_v28, %v492_v34 }
 0x149   :  { %1592 = vmatmul.msk.bf16.gmra.mxu1 %vm419_vm1, %v390_v35  ;;  %1607 = vmatmul.msk.bf16.gmra.mxu2 %vm101_vm0, %v695_v36  ;;  %v263_v39 = vmax.f32 %v220_v37, 0.0  ;;  %v563_v40 = vmax.f32 %v493_v38, 0.0 }
 0x14b   :  { %v295_v45 = vpack.c.bf16 %v263_v39, %v263_v39  ;;  %v595_v46 = vpack.c.bf16 %v563_v40, %v563_v40 }
 0x14d   :  { %v371_v51 = vunpack.c.l.b16 %v295_v45  ;;  %v667_v52 = vunpack.c.l.b16 %v595_v46 }
 0x14e   :  { %v221_v41 = vpop.f32.mrf.mxu0  ;;  %v494_v42 = vpop.f32.mrf.mxu1 }
 0x14f   :  { %v222_v43 = vadd.f32 %v1915_v32, %v221_v41  ;;  %v495_v44 = vadd.f32 %v2002_v28, %v494_v42 }
 0x151   :  { %v264_v47 = vmax.f32 %v222_v43, 0.0  ;;  %v564_v48 = vmax.f32 %v495_v44, 0.0 }
 0x153   :  { %v296_v49 = vpack.c.bf16 %v264_v47, %v264_v47  ;;  %v596_v50 = vpack.c.bf16 %v564_v48, %v564_v48 }
 0x155   :  { %v372_v53 = vunpack.c.l.b16 %v296_v49  ;;  %v668_v54 = vunpack.c.l.b16 %v596_v50 }
 0x156   :  { %v224_v55 = vpop.f32.mrf.mxu0  ;;  %v497_v56 = vpop.f32.mrf.mxu1 }
 0x157   :  { %v391_v57 = vpack.c.b16 %v372_v53, %v371_v51  ;;  %v696_v58 = vpack.c.b16 %v668_v54, %v667_v52  ;;  %v225_v59 = vadd.f32 %v1915_v32, %v224_v55  ;;  %v498_v60 = vadd.f32 %v2002_v28, %v497_v56 }
 0x159   :  { %1593 = vmatmul.msk.bf16.gmra.mxu1 %vm419_vm1, %v391_v57  ;;  %1608 = vmatmul.msk.bf16.gmra.mxu2 %vm101_vm0, %v696_v58  ;;  %v265_v61 = vmax.f32 %v225_v59, 0.0  ;;  %v565_v62 = vmax.f32 %v498_v60, 0.0 }
 0x15b   :  { %v297_v3 = vpack.c.bf16 %v265_v61, %v265_v61  ;;  %v597_v4 = vpack.c.bf16 %v565_v62, %v565_v62 }
 0x15d   :  { %v373_v9 = vunpack.c.l.b16 %v297_v3  ;;  %v669_v10 = vunpack.c.l.b16 %v597_v4 }
 0x15e   :  { %v226_v63 = vpop.f32.mrf.mxu0  ;;  %v499_v0 = vpop.f32.mrf.mxu1 }
 0x15f   :  { %v227_v1 = vadd.f32 %v1915_v32, %v226_v63  ;;  %v500_v2 = vadd.f32 %v2002_v28, %v499_v0 }
 0x161   :  { %v266_v5 = vmax.f32 %v227_v1, 0.0  ;;  %v566_v6 = vmax.f32 %v500_v2, 0.0 }
 0x163   :  { %v298_v7 = vpack.c.bf16 %v266_v5, %v266_v5  ;;  %v598_v8 = vpack.c.bf16 %v566_v6, %v566_v6 }
 0x165   :  { %v374_v11 = vunpack.c.l.b16 %v298_v7  ;;  %v670_v12 = vunpack.c.l.b16 %v598_v8 }
 0x166   :  { %v229_v13 = vpop.f32.mrf.mxu0  ;;  %v502_v14 = vpop.f32.mrf.mxu1 }
 0x167   :  { %v392_v15 = vpack.c.b16 %v374_v11, %v373_v9  ;;  %v697_v16 = vpack.c.b16 %v670_v12, %v669_v10  ;;  %v230_v17 = vadd.f32 %v1915_v32, %v229_v13  ;;  %v503_v18 = vadd.f32 %v2002_v28, %v502_v14  ;;  %v1649_v9 = vld [vmem:[%s2622_s7] sm:$0xff] }
 0x168   :  { %1070 = vmatpush.bf16.msra.mxu3 %v1649_v9 }
 0x169   :  { %1594 = vmatmul.msk.bf16.gmra.mxu1 %vm419_vm1, %v392_v15  ;;  %1609 = vmatmul.msk.bf16.gmra.mxu2 %vm101_vm0, %v697_v16  ;;  %v267_v19 = vmax.f32 %v230_v17, 0.0  ;;  %v567_v20 = vmax.f32 %v503_v18, 0.0 }
 0x16b   :  { %v299_v25 = vpack.c.bf16 %v267_v19, %v267_v19  ;;  %v599_v26 = vpack.c.bf16 %v567_v20, %v567_v20 }
 0x16d   :  { %v375_v33 = vunpack.c.l.b16 %v299_v25  ;;  %v671_v34 = vunpack.c.l.b16 %v599_v26 }
 0x16e   :  { %v231_v21 = vpop.f32.mrf.mxu0  ;;  %v504_v22 = vpop.f32.mrf.mxu1 }
 0x16f   :  { %v232_v23 = vadd.f32 %v1915_v32, %v231_v21  ;;  %v505_v24 = vadd.f32 %v2002_v28, %v504_v22  ;;  %v2060_v21 = vld [vmem:[%s2621_s6] ss:$0 sm:$0xff] }
 0x171   :  { %v268_v27 = vmax.f32 %v232_v23, 0.0  ;;  %v568_v29 = vmax.f32 %v505_v24, 0.0 }
 0x173   :  { %v300_v30 = vpack.c.bf16 %v268_v27, %v268_v27  ;;  %v600_v31 = vpack.c.bf16 %v568_v29, %v568_v29 }
 0x175   :  { %v376_v35 = vunpack.c.l.b16 %v300_v30  ;;  %v672_v36 = vunpack.c.l.b16 %v600_v31 }
 0x176   :  { %v234_v37 = vpop.f32.mrf.mxu0  ;;  %v507_v38 = vpop.f32.mrf.mxu1 }
 0x177   :  { %v393_v39 = vpack.c.b16 %v376_v35, %v375_v33  ;;  %v698_v40 = vpack.c.b16 %v672_v36, %v671_v34  ;;  %v235_v41 = vadd.f32 %v1915_v32, %v234_v37  ;;  %v508_v42 = vadd.f32 %v2002_v28, %v507_v38 }
 0x179   :  { %1595 = vmatmul.msk.bf16.gmra.mxu1 %vm419_vm1, %v393_v39  ;;  %1610 = vmatmul.msk.bf16.gmra.mxu2 %vm101_vm0, %v698_v40  ;;  %v269_v43 = vmax.f32 %v235_v41, 0.0  ;;  %v569_v44 = vmax.f32 %v508_v42, 0.0 }
 0x17b   :  { %v301_v49 = vpack.c.bf16 %v269_v43, %v269_v43  ;;  %v601_v50 = vpack.c.bf16 %v569_v44, %v569_v44 }
 0x17d   :  { %v377_v55 = vunpack.c.l.b16 %v301_v49  ;;  %v673_v56 = vunpack.c.l.b16 %v601_v50 }
 0x17e   :  { %v236_v45 = vpop.f32.mrf.mxu0  ;;  %v509_v46 = vpop.f32.mrf.mxu1 }
 0x17f   :  { %v237_v47 = vadd.f32 %v1915_v32, %v236_v45  ;;  %v510_v48 = vadd.f32 %v2002_v28, %v509_v46 }
 0x181   :  { %v270_v51 = vmax.f32 %v237_v47, 0.0  ;;  %v570_v52 = vmax.f32 %v510_v48, 0.0 }
 0x183   :  { %v302_v53 = vpack.c.bf16 %v270_v51, %v270_v51  ;;  %v602_v54 = vpack.c.bf16 %v570_v52, %v570_v52 }
 0x185   :  { %v378_v57 = vunpack.c.l.b16 %v302_v53  ;;  %v674_v58 = vunpack.c.l.b16 %v602_v54 }
 0x186   :  { %v512_v59 = vpop.f32.mrf.mxu1 }
 0x187   :  { %v394_v60 = vpack.c.b16 %v378_v57, %v377_v55  ;;  %v699_v61 = vpack.c.b16 %v674_v58, %v673_v56  ;;  %v513_v62 = vadd.f32 %v2002_v28, %v512_v59 }
 0x189   :  { %1596 = vmatmul.msk.bf16.gmra.mxu1 %vm419_vm1, %v394_v60  ;;  %1611 = vmatmul.msk.bf16.gmra.mxu2 %vm101_vm0, %v699_v61  ;;  %v571_v32 = vmax.f32 %v513_v62, 0.0 }
 0x18b   :  { %v603_v1 = vpack.c.bf16 %v571_v32, %v571_v32 }
 0x18d   :  { %v675_v4 = vunpack.c.l.b16 %v603_v1 }
 0x18e   :  { %v514_v63 = vpop.f32.mrf.mxu1 }
 0x18f   :  { %v515_v0 = vadd.f32 %v2002_v28, %v514_v63 }
 0x191   :  { %v572_v2 = vmax.f32 %v515_v0, 0.0 }
 0x193   :  { %v604_v3 = vpack.c.bf16 %v572_v2, %v572_v2 }
 0x195   :  { %v676_v5 = vunpack.c.l.b16 %v604_v3 }
 0x196   :  { %v517_v6 = vpop.f32.mrf.mxu1 }
 0x197   :  { %v700_v7 = vpack.c.b16 %v676_v5, %v675_v4  ;;  %v518_v8 = vadd.f32 %v2002_v28, %v517_v6 }
 0x199   :  { %1612 = vmatmul.msk.bf16.gmra.mxu2 %vm101_vm0, %v700_v7  ;;  %v573_v10 = vmax.f32 %v518_v8, 0.0 }
 0x19b   :  { %v605_v13 = vpack.c.bf16 %v573_v10, %v573_v10 }
 0x19d   :  { %v677_v16 = vunpack.c.l.b16 %v605_v13 }
 0x19e   :  { %v519_v11 = vpop.f32.mrf.mxu1 }
 0x19f   :  { %v520_v12 = vadd.f32 %v2002_v28, %v519_v11 }
 0x1a1   :  { %v574_v14 = vmax.f32 %v520_v12, 0.0 }
 0x1a3   :  { %v606_v15 = vpack.c.bf16 %v574_v14, %v574_v14 }
 0x1a5   :  { %v678_v17 = vunpack.c.l.b16 %v606_v15 }
 0x1a6   :  { %v522_v18 = vpop.f32.mrf.mxu1 }
 0x1a7   :  { %v701_v19 = vpack.c.b16 %v678_v17, %v677_v16  ;;  %v523_v20 = vadd.f32 %v2002_v28, %v522_v18 }
 0x1a9   :  { %1613 = vmatmul.msk.bf16.gmra.mxu2 %vm101_vm0, %v701_v19  ;;  %v575_v23 = vmax.f32 %v523_v20, 0.0 }
 0x1ab   :  { %v607_v27 = vpack.c.bf16 %v575_v23, %v575_v23 }
 0x1ac   :  { %v778_v22 = vpop.f32.mrf.mxu2 }
 0x1ad   :  { %v779_v25 = vadd.f32 %v2060_v21, %v778_v22  ;;  %v679_v34 = vunpack.c.l.b16 %v607_v27 }
 0x1ae   :  { %v524_v24 = vpop.f32.mrf.mxu1 }
 0x1af   :  { %v525_v26 = vadd.f32 %v2002_v28, %v524_v24  ;;  %v858_v30 = vmax.f32 %v779_v25, 0.0 }
 0x1b1   :  { %v576_v29 = vmax.f32 %v525_v26, 0.0  ;;  %v890_v38 = vpack.c.bf16 %v858_v30, %v858_v30 }
 0x1b3   :  { %v608_v31 = vpack.c.bf16 %v576_v29, %v576_v29  ;;  %v960_v43 = vunpack.c.l.b16 %v890_v38 }
 0x1b4   :  { %v780_v33 = vpop.f32.mrf.mxu2 }
 0x1b5   :  { %v680_v35 = vunpack.c.l.b16 %v608_v31  ;;  %v781_v36 = vadd.f32 %v2060_v21, %v780_v33 }
 0x1b6   :  { %v527_v37 = vpop.f32.mrf.mxu1 }
 0x1b7   :  { %v859_v39 = vmax.f32 %v781_v36, 0.0  ;;  %v702_v40 = vpack.c.b16 %v680_v35, %v679_v34  ;;  %v528_v42 = vadd.f32 %v2002_v28, %v527_v37 }
 0x1b9   :  { %v891_v41 = vpack.c.bf16 %v859_v39, %v859_v39  ;;  %1614 = vmatmul.msk.bf16.gmra.mxu2 %vm101_vm0, %v702_v40  ;;  %v577_v46 = vmax.f32 %v528_v42, 0.0 }
 0x1bb   :  { %v961_v44 = vunpack.c.l.b16 %v891_v41  ;;  %v609_v51 = vpack.c.bf16 %v577_v46, %v577_v46 }
 0x1bc   :  { %v783_v45 = vpop.f32.mrf.mxu2 }
 0x1bd   :  { %v992_v47 = vpack.c.b16 %v961_v44, %v960_v43  ;;  %v784_v49 = vadd.f32 %v2060_v21, %v783_v45  ;;  %v681_v56 = vunpack.c.l.b16 %v609_v51 }
 0x1be   :  { %v529_v48 = vpop.f32.mrf.mxu1 }
 0x1bf   :  { %v530_v50 = vadd.f32 %v2002_v28, %v529_v48  ;;  %1625 = vmatmul.msk.bf16.vlgmr.msra.gmra.mxu3 %vm1014_vm2, %v992_v47  ;;  %v860_v53 = vmax.f32 %v784_v49, 0.0 }
 0x1c1   :  { %v578_v52 = vmax.f32 %v530_v50, 0.0  ;;  %v892_v60 = vpack.c.bf16 %v860_v53, %v860_v53 }
 0x1c3   :  { %v610_v54 = vpack.c.bf16 %v578_v52, %v578_v52  ;;  %v962_v0 = vunpack.c.l.b16 %v892_v60 }
 0x1c4   :  { %v785_v55 = vpop.f32.mrf.mxu2 }
 0x1c5   :  { %v682_v57 = vunpack.c.l.b16 %v610_v54  ;;  %v786_v58 = vadd.f32 %v2060_v21, %v785_v55 }
 0x1c6   :  { %v532_v59 = vpop.f32.mrf.mxu1 }
 0x1c7   :  { %v861_v61 = vmax.f32 %v786_v58, 0.0  ;;  %v703_v62 = vpack.c.b16 %v682_v57, %v681_v56  ;;  %v533_v63 = vadd.f32 %v2002_v28, %v532_v59 }
 0x1c9   :  { %v893_v32 = vpack.c.bf16 %v861_v61, %v861_v61  ;;  %1615 = vmatmul.msk.bf16.gmra.mxu2 %vm101_vm0, %v703_v62  ;;  %v579_v3 = vmax.f32 %v533_v63, 0.0 }
 0x1cb   :  { %v963_v1 = vunpack.c.l.b16 %v893_v32  ;;  %v611_v8 = vpack.c.bf16 %v579_v3, %v579_v3 }
 0x1cc   :  { %v788_v2 = vpop.f32.mrf.mxu2 }
 0x1cd   :  { %v993_v4 = vpack.c.b16 %v963_v1, %v962_v0  ;;  %v789_v6 = vadd.f32 %v2060_v21, %v788_v2  ;;  %v683_v13 = vunpack.c.l.b16 %v611_v8 }
 0x1ce   :  { %v534_v5 = vpop.f32.mrf.mxu1 }
 0x1cf   :  { %v535_v7 = vadd.f32 %v2002_v28, %v534_v5  ;;  %1626 = vmatmul.msk.bf16.gmra.mxu3 %vm1014_vm2, %v993_v4  ;;  %v862_v10 = vmax.f32 %v789_v6, 0.0 }
 0x1d1   :  { %v580_v9 = vmax.f32 %v535_v7, 0.0  ;;  %v894_v17 = vpack.c.bf16 %v862_v10, %v862_v10 }
 0x1d3   :  { %v612_v11 = vpack.c.bf16 %v580_v9, %v580_v9  ;;  %v964_v23 = vunpack.c.l.b16 %v894_v17 }
 0x1d4   :  { %v790_v12 = vpop.f32.mrf.mxu2 }
 0x1d5   :  { %v684_v14 = vunpack.c.l.b16 %v612_v11  ;;  %v791_v15 = vadd.f32 %v2060_v21, %v790_v12 }
 0x1d6   :  { %v537_v16 = vpop.f32.mrf.mxu1 }
 0x1d7   :  { %v863_v18 = vmax.f32 %v791_v15, 0.0  ;;  %v704_v19 = vpack.c.b16 %v684_v14, %v683_v13  ;;  %v538_v22 = vadd.f32 %v2002_v28, %v537_v16 }
 0x1d9   :  { %v895_v20 = vpack.c.bf16 %v863_v18, %v863_v18  ;;  %1616 = vmatmul.msk.bf16.gmra.mxu2 %vm101_vm0, %v704_v19  ;;  %v581_v26 = vmax.f32 %v538_v22, 0.0 }
 0x1db   :  { %v965_v24 = vunpack.c.l.b16 %v895_v20  ;;  %v613_v33 = vpack.c.bf16 %v581_v26, %v581_v26 }
 0x1dc   :  { %v793_v25 = vpop.f32.mrf.mxu2 }
 0x1dd   :  { %v994_v27 = vpack.c.b16 %v965_v24, %v964_v23  ;;  %v794_v30 = vadd.f32 %v2060_v21, %v793_v25  ;;  %v685_v38 = vunpack.c.l.b16 %v613_v33 }
 0x1de   :  { %v539_v29 = vpop.f32.mrf.mxu1 }
 0x1df   :  { %v540_v31 = vadd.f32 %v2002_v28, %v539_v29  ;;  %1627 = vmatmul.msk.bf16.gmra.mxu3 %vm1014_vm2, %v994_v27  ;;  %v864_v35 = vmax.f32 %v794_v30, 0.0 }
 0x1e1   :  { %v582_v34 = vmax.f32 %v540_v31, 0.0  ;;  %v896_v42 = vpack.c.bf16 %v864_v35, %v864_v35 }
 0x1e3   :  { %v614_v36 = vpack.c.bf16 %v582_v34, %v582_v34  ;;  %v966_v47 = vunpack.c.l.b16 %v896_v42 }
 0x1e4   :  { %v795_v37 = vpop.f32.mrf.mxu2 }
 0x1e5   :  { %v686_v39 = vunpack.c.l.b16 %v614_v36  ;;  %v796_v40 = vadd.f32 %v2060_v21, %v795_v37 }
 0x1e6   :  { %v542_v41 = vpop.f32.mrf.mxu1 }
 0x1e7   :  { %v705_v43 = vpack.c.b16 %v686_v39, %v685_v38  ;;  %v865_v44 = vmax.f32 %v796_v40, 0.0  ;;  %v543_v46 = vadd.f32 %v2002_v28, %v542_v41 }
 0x1e9   :  { %v897_v45 = vpack.c.bf16 %v865_v44, %v865_v44  ;;  %1617 = vmatmul.msk.bf16.gmra.mxu2 %vm101_vm0, %v705_v43  ;;  %v583_v50 = vmax.f32 %v543_v46, 0.0 }
 0x1eb   :  { %v967_v48 = vunpack.c.l.b16 %v897_v45  ;;  %v615_v55 = vpack.c.bf16 %v583_v50, %v583_v50 }
 0x1ec   :  { %v798_v49 = vpop.f32.mrf.mxu2 }
 0x1ed   :  { %v995_v51 = vpack.c.b16 %v967_v48, %v966_v47  ;;  %v799_v53 = vadd.f32 %v2060_v21, %v798_v49  ;;  %v687_v60 = vunpack.c.l.b16 %v615_v55 }
 0x1ee   :  { %v544_v52 = vpop.f32.mrf.mxu1 }
 0x1ef   :  { %v545_v54 = vadd.f32 %v2002_v28, %v544_v52  ;;  %1628 = vmatmul.msk.bf16.gmra.mxu3 %vm1014_vm2, %v995_v51  ;;  %v866_v57 = vmax.f32 %v799_v53, 0.0 }
 0x1f1   :  { %v584_v56 = vmax.f32 %v545_v54, 0.0  ;;  %v898_v63 = vpack.c.bf16 %v866_v57, %v866_v57 }
 0x1f3   :  { %v616_v58 = vpack.c.bf16 %v584_v56, %v584_v56  ;;  %v968_v4 = vunpack.c.l.b16 %v898_v63 }
 0x1f4   :  { %v800_v59 = vpop.f32.mrf.mxu2 }
 0x1f5   :  { %v688_v61 = vunpack.c.l.b16 %v616_v58  ;;  %v801_v62 = vadd.f32 %v2060_v21, %v800_v59 }
 0x1f6   :  { %v547_v32 = vpop.f32.mrf.mxu1 }
 0x1f7   :  { %v706_v0 = vpack.c.b16 %v688_v61, %v687_v60  ;;  %v867_v1 = vmax.f32 %v801_v62, 0.0  ;;  %v548_v3 = vadd.f32 %v2002_v28, %v547_v32 }
 0x1f9   :  { %v899_v2 = vpack.c.bf16 %v867_v1, %v867_v1  ;;  %1618 = vmatmul.msk.bf16.gmra.mxu2 %vm101_vm0, %v706_v0  ;;  %v585_v7 = vmax.f32 %v548_v3, 0.0 }
 0x1fb   :  { %v969_v5 = vunpack.c.l.b16 %v899_v2  ;;  %v617_v12 = vpack.c.bf16 %v585_v7, %v585_v7 }
 0x1fc   :  { %v803_v6 = vpop.f32.mrf.mxu2 }
 0x1fd   :  { %v996_v8 = vpack.c.b16 %v969_v5, %v968_v4  ;;  %v804_v10 = vadd.f32 %v2060_v21, %v803_v6  ;;  %v689_v17 = vunpack.c.l.b16 %v617_v12 }
 0x1fe   :  { %v549_v9 = vpop.f32.mrf.mxu1 }
 0x1ff   :  { %v550_v11 = vadd.f32 %v2002_v28, %v549_v9  ;;  %1629 = vmatmul.msk.bf16.gmra.mxu3 %vm1014_vm2, %v996_v8  ;;  %v868_v14 = vmax.f32 %v804_v10, 0.0  ;;  %v2113_v10 = vld [vmem:[%s2623_s8] ss:$0 sm:$0xff] }
 0x201   :  { %v586_v13 = vmax.f32 %v550_v11, 0.0  ;;  %v900_v22 = vpack.c.bf16 %v868_v14, %v868_v14 }
 0x203   :  { %v618_v15 = vpack.c.bf16 %v586_v13, %v586_v13  ;;  %v970_v27 = vunpack.c.l.b16 %v900_v22 }
 0x204   :  { %v805_v16 = vpop.f32.mrf.mxu2 }
 0x205   :  { %v690_v18 = vunpack.c.l.b16 %v618_v15  ;;  %v806_v19 = vadd.f32 %v2060_v21, %v805_v16 }
 0x206   :  { %v552_v20 = vpop.f32.mrf.mxu1 }
 0x207   :  { %v707_v23 = vpack.c.b16 %v690_v18, %v689_v17  ;;  %v869_v24 = vmax.f32 %v806_v19, 0.0  ;;  %v553_v26 = vadd.f32 %v2002_v28, %v552_v20 }
 0x209   :  { %v901_v25 = vpack.c.bf16 %v869_v24, %v869_v24  ;;  %1619 = vmatmul.msk.bf16.gmra.mxu2 %vm101_vm0, %v707_v23  ;;  %v587_v31 = vmax.f32 %v553_v26, 0.0 }
 0x20b   :  { %v971_v29 = vunpack.c.l.b16 %v901_v25  ;;  %v619_v37 = vpack.c.bf16 %v587_v31, %v587_v31 }
 0x20c   :  { %v808_v30 = vpop.f32.mrf.mxu2 }
 0x20d   :  { %v997_v33 = vpack.c.b16 %v971_v29, %v970_v27  ;;  %v809_v35 = vadd.f32 %v2060_v21, %v808_v30  ;;  %v691_v42 = vunpack.c.l.b16 %v619_v37 }
 0x20e   :  { %v554_v34 = vpop.f32.mrf.mxu1 }
 0x20f   :  { %v555_v36 = vadd.f32 %v2002_v28, %v554_v34  ;;  %1630 = vmatmul.msk.bf16.gmra.mxu3 %vm1014_vm2, %v997_v33  ;;  %v870_v39 = vmax.f32 %v809_v35, 0.0 }
 0x211   :  { %v588_v38 = vmax.f32 %v555_v36, 0.0  ;;  %v902_v45 = vpack.c.bf16 %v870_v39, %v870_v39 }
 0x213   :  { %v620_v40 = vpack.c.bf16 %v588_v38, %v588_v38  ;;  %v972_v49 = vunpack.c.l.b16 %v902_v45 }
 0x214   :  { %v810_v41 = vpop.f32.mrf.mxu2 }
 0x215   :  { %v692_v43 = vunpack.c.l.b16 %v620_v40  ;;  %v811_v44 = vadd.f32 %v2060_v21, %v810_v41 }
 0x217   :  { %v708_v46 = vpack.c.b16 %v692_v43, %v691_v42  ;;  %v871_v47 = vmax.f32 %v811_v44, 0.0 }
 0x219   :  { %v903_v48 = vpack.c.bf16 %v871_v47, %v871_v47  ;;  %1620 = vmatmul.msk.bf16.gmra.mxu2 %vm101_vm0, %v708_v46 }
 0x21b   :  { %v973_v50 = vunpack.c.l.b16 %v903_v48 }
 0x21c   :  { %v813_v28 = vpop.f32.mrf.mxu2 }
 0x21d   :  { %v998_v51 = vpack.c.b16 %v973_v50, %v972_v49  ;;  %v814_v52 = vadd.f32 %v2060_v21, %v813_v28 }
 0x21f   :  { %1631 = vmatmul.msk.bf16.gmra.mxu3 %vm1014_vm2, %v998_v51  ;;  %v872_v53 = vmax.f32 %v814_v52, 0.0 }
 0x221   :  { %v904_v56 = vpack.c.bf16 %v872_v53, %v872_v53 }
 0x223   :  { %v974_v59 = vunpack.c.l.b16 %v904_v56 }
 0x224   :  { %v815_v54 = vpop.f32.mrf.mxu2 }
 0x225   :  { %v816_v55 = vadd.f32 %v2060_v21, %v815_v54 }
 0x227   :  { %v873_v57 = vmax.f32 %v816_v55, 0.0 }
 0x229   :  { %v905_v58 = vpack.c.bf16 %v873_v57, %v873_v57 }
 0x22b   :  { %v975_v60 = vunpack.c.l.b16 %v905_v58 }
 0x22c   :  { %v818_v61 = vpop.f32.mrf.mxu2 }
 0x22d   :  { %v999_v62 = vpack.c.b16 %v975_v60, %v974_v59  ;;  %v819_v32 = vadd.f32 %v2060_v21, %v818_v61 }
 0x22f   :  { %1632 = vmatmul.msk.bf16.gmra.mxu3 %vm1014_vm2, %v999_v62  ;;  %v874_v63 = vmax.f32 %v819_v32, 0.0 }
 0x231   :  { %v906_v2 = vpack.c.bf16 %v874_v63, %v874_v63 }
 0x233   :  { %v976_v5 = vunpack.c.l.b16 %v906_v2 }
 0x234   :  { %v820_v0 = vpop.f32.mrf.mxu2 }
 0x235   :  { %v821_v1 = vadd.f32 %v2060_v21, %v820_v0 }
 0x237   :  { %v875_v3 = vmax.f32 %v821_v1, 0.0 }
 0x239   :  { %v907_v4 = vpack.c.bf16 %v875_v3, %v875_v3 }
 0x23b   :  { %v977_v6 = vunpack.c.l.b16 %v907_v4 }
 0x23c   :  { %v823_v7 = vpop.f32.mrf.mxu2 }
 0x23d   :  { %v1000_v8 = vpack.c.b16 %v977_v6, %v976_v5  ;;  %v824_v9 = vadd.f32 %v2060_v21, %v823_v7 }
 0x23f   :  { %1633 = vmatmul.msk.bf16.gmra.mxu3 %vm1014_vm2, %v1000_v8  ;;  %v876_v12 = vmax.f32 %v824_v9, 0.0 }
 0x241   :  { %v908_v17 = vpack.c.bf16 %v876_v12, %v876_v12 }
 0x242   :  { %v1072_v11 = vpop.f32.mrf.mxu3 }
 0x243   :  { %v2116_v13 = vadd.f32 %v2113_v10, %v1072_v11  ;;  %v978_v22 = vunpack.c.l.b16 %v908_v17 }
 0x244   :  { %v825_v14 = vpop.f32.mrf.mxu2 }
 0x245   :  { %v826_v15 = vadd.f32 %v2060_v21, %v825_v14  ;;  %v1153_v16 = vsel %vm1152_vm3, %v2116_v13, -inf }
 0x246   :  { %1154 = vmax.xlane.f32.xlu0 %v1153_v16 }
 0x247   :  { %v877_v18 = vmax.f32 %v826_v15, 0.0 }
 0x249   :  { %v909_v19 = vpack.c.bf16 %v877_v18, %v877_v18 }
 0x24a   :  { %v1074_v20 = vpop.f32.mrf.mxu3 }
 0x24b   :  { %v979_v23 = vunpack.c.l.b16 %v909_v19  ;;  %v2122_v24 = vadd.f32 %v2113_v10, %v1074_v20 }
 0x24c   :  { %v828_v25 = vpop.f32.mrf.mxu2 }
 0x24d   :  { %v1156_v26 = vsel %vm1152_vm3, %v2122_v24, -inf  ;;  %v1001_v27 = vpack.c.b16 %v979_v23, %v978_v22  ;;  %v829_v29 = vadd.f32 %v2060_v21, %v828_v25 }
 0x24e   :  { %1157 = vmax.xlane.f32.xlu0 %v1156_v26 }
 0x24f   :  { %1634 = vmatmul.msk.bf16.gmra.mxu3 %vm1014_vm2, %v1001_v27  ;;  %v878_v31 = vmax.f32 %v829_v29, 0.0 }
 0x251   :  { %v910_v37 = vpack.c.bf16 %v878_v31, %v878_v31 }
 0x252   :  { %v1077_v30 = vpop.f32.mrf.mxu3 }
 0x253   :  { %v2129_v33 = vadd.f32 %v2113_v10, %v1077_v30  ;;  %v980_v41 = vunpack.c.l.b16 %v910_v37 }
 0x254   :  { %v830_v34 = vpop.f32.mrf.mxu2 }
 0x255   :  { %v831_v35 = vadd.f32 %v2060_v21, %v830_v34  ;;  %v1159_v36 = vsel %vm1152_vm3, %v2129_v33, -inf }
 0x256   :  { %1160 = vmax.xlane.f32.xlu1 %v1159_v36 }
 0x257   :  { %v879_v38 = vmax.f32 %v831_v35, 0.0 }
 0x259   :  { %v911_v39 = vpack.c.bf16 %v879_v38, %v879_v38 }
 0x25a   :  { %v1079_v40 = vpop.f32.mrf.mxu3 }
 0x25b   :  { %v981_v42 = vunpack.c.l.b16 %v911_v39  ;;  %v2135_v43 = vadd.f32 %v2113_v10, %v1079_v40 }
 0x25c   :  { %v833_v44 = vpop.f32.mrf.mxu2 }
 0x25d   :  { %v1162_v45 = vsel %vm1152_vm3, %v2135_v43, -inf  ;;  %v1002_v46 = vpack.c.b16 %v981_v42, %v980_v41  ;;  %v834_v47 = vadd.f32 %v2060_v21, %v833_v44 }
 0x25e   :  { %1163 = vmax.xlane.f32.xlu1 %v1162_v45 }
 0x25f   :  { %1635 = vmatmul.msk.bf16.gmra.mxu3 %vm1014_vm2, %v1002_v46  ;;  %v880_v49 = vmax.f32 %v834_v47, 0.0 }
 0x261   :  { %v912_v53 = vpack.c.bf16 %v880_v49, %v880_v49 }
 0x262   :  { %v1082_v48 = vpop.f32.mrf.mxu3 }
 0x263   :  { %v2142_v50 = vadd.f32 %v2113_v10, %v1082_v48  ;;  %v982_v57 = vunpack.c.l.b16 %v912_v53 }
 0x264   :  { %v835_v28 = vpop.f32.mrf.mxu2 }
 0x265   :  { %v836_v51 = vadd.f32 %v2060_v21, %v835_v28  ;;  %v1165_v52 = vsel %vm1152_vm3, %v2142_v50, -inf }
 0x266   :  { %1166 = vmax.xlane.f32.xlu2 %v1165_v52 }
 0x267   :  { %v881_v54 = vmax.f32 %v836_v51, 0.0 }
 0x269   :  { %v913_v55 = vpack.c.bf16 %v881_v54, %v881_v54 }
 0x26a   :  { %v1084_v56 = vpop.f32.mrf.mxu3 }
 0x26b   :  { %v983_v58 = vunpack.c.l.b16 %v913_v55  ;;  %v2148_v59 = vadd.f32 %v2113_v10, %v1084_v56 }
 0x26c   :  { %v838_v60 = vpop.f32.mrf.mxu2 }
 0x26d   :  { %v1168_v61 = vsel %vm1152_vm3, %v2148_v59, -inf  ;;  %v1003_v62 = vpack.c.b16 %v983_v58, %v982_v57  ;;  %v839_v32 = vadd.f32 %v2060_v21, %v838_v60 }
 0x26e   :  { %1169 = vmax.xlane.f32.xlu2 %v1168_v61 }
 0x26f   :  { %1636 = vmatmul.msk.bf16.gmra.mxu3 %vm1014_vm2, %v1003_v62  ;;  %v882_v0 = vmax.f32 %v839_v32, 0.0 }
 0x271   :  { %v914_v5 = vpack.c.bf16 %v882_v0, %v882_v0 }
 0x272   :  { %v1087_v63 = vpop.f32.mrf.mxu3 }
 0x273   :  { %v2155_v1 = vadd.f32 %v2113_v10, %v1087_v63  ;;  %v984_v9 = vunpack.c.l.b16 %v914_v5 }
 0x274   :  { %v840_v2 = vpop.f32.mrf.mxu2 }
 0x275   :  { %v841_v3 = vadd.f32 %v2060_v21, %v840_v2  ;;  %v1171_v4 = vsel %vm1152_vm3, %v2155_v1, -inf }
 0x276   :  { %1172 = vmax.xlane.f32.xlu0 %v1171_v4 }
 0x277   :  { %v883_v6 = vmax.f32 %v841_v3, 0.0 }
 0x279   :  { %v915_v7 = vpack.c.bf16 %v883_v6, %v883_v6 }
 0x27a   :  { %v1089_v8 = vpop.f32.mrf.mxu3 }
 0x27b   :  { %v985_v11 = vunpack.c.l.b16 %v915_v7  ;;  %v2161_v12 = vadd.f32 %v2113_v10, %v1089_v8 }
 0x27c   :  { %v843_v14 = vpop.f32.mrf.mxu2 }
 0x27d   :  { %v1004_v15 = vpack.c.b16 %v985_v11, %v984_v9  ;;  %v1174_v16 = vsel %vm1152_vm3, %v2161_v12, -inf  ;;  %v844_v17 = vadd.f32 %v2060_v21, %v843_v14 }
 0x27e   :  { %1175 = vmax.xlane.f32.xlu1 %v1174_v16 }
 0x27f   :  { %1637 = vmatmul.msk.bf16.gmra.mxu3 %vm1014_vm2, %v1004_v15  ;;  %v884_v19 = vmax.f32 %v844_v17, 0.0 }
 0x281   :  { %v916_v26 = vpack.c.bf16 %v884_v19, %v884_v19 }
 0x282   :  { %v1092_v18 = vpop.f32.mrf.mxu3 }
 0x283   :  { %v2168_v20 = vadd.f32 %v2113_v10, %v1092_v18  ;;  %v986_v31 = vunpack.c.l.b16 %v916_v26 }
 0x284   :  { %v845_v22 = vpop.f32.mrf.mxu2 }
 0x285   :  { %v846_v23 = vadd.f32 %v2060_v21, %v845_v22  ;;  %v1177_v25 = vsel %vm1152_vm3, %v2168_v20, -inf }
 0x286   :  { %1178 = vmax.xlane.f32.xlu2 %v1177_v25 }
 0x287   :  { %v885_v27 = vmax.f32 %v846_v23, 0.0 }
 0x289   :  { %v917_v29 = vpack.c.bf16 %v885_v27, %v885_v27 }
 0x28a   :  { %v1094_v30 = vpop.f32.mrf.mxu3 }
 0x28b   :  { %v987_v34 = vunpack.c.l.b16 %v917_v29  ;;  %v2174_v35 = vadd.f32 %v2113_v10, %v1094_v30 }
 0x28c   :  { %v848_v36 = vpop.f32.mrf.mxu2 }
 0x28d   :  { %v1005_v37 = vpack.c.b16 %v987_v34, %v986_v31  ;;  %v1180_v38 = vsel %vm1152_vm3, %v2174_v35, -inf  ;;  %v849_v39 = vadd.f32 %v2060_v21, %v848_v36 }
 0x28e   :  { %1181 = vmax.xlane.f32.xlu0 %v1180_v38 }
 0x28f   :  { %1638 = vmatmul.msk.bf16.gmra.mxu3 %vm1014_vm2, %v1005_v37  ;;  %v886_v41 = vmax.f32 %v849_v39, 0.0 }
 0x291   :  { %v918_v47 = vpack.c.bf16 %v886_v41, %v886_v41 }
 0x292   :  { %v1097_v40 = vpop.f32.mrf.mxu3 }
 0x293   :  { %v2181_v42 = vadd.f32 %v2113_v10, %v1097_v40  ;;  %v988_v51 = vunpack.c.l.b16 %v918_v47 }
 0x294   :  { %v850_v44 = vpop.f32.mrf.mxu2 }
 0x295   :  { %v851_v45 = vadd.f32 %v2060_v21, %v850_v44  ;;  %v1183_v46 = vsel %vm1152_vm3, %v2181_v42, -inf }
 0x296   :  { %1184 = vmax.xlane.f32.xlu1 %v1183_v46 }
 0x297   :  { %v887_v48 = vmax.f32 %v851_v45, 0.0 }
 0x299   :  { %v919_v49 = vpack.c.bf16 %v887_v48, %v887_v48 }
 0x29a   :  { %v1099_v28 = vpop.f32.mrf.mxu3 }
 0x29b   :  { %v989_v52 = vunpack.c.l.b16 %v919_v49  ;;  %v2187_v53 = vadd.f32 %v2113_v10, %v1099_v28 }
 0x29c   :  { %v853_v54 = vpop.f32.mrf.mxu2 }
 0x29d   :  { %v1006_v55 = vpack.c.b16 %v989_v52, %v988_v51  ;;  %v1186_v56 = vsel %vm1152_vm3, %v2187_v53, -inf  ;;  %v854_v57 = vadd.f32 %v2060_v21, %v853_v54 }
 0x29e   :  { %1187 = vmax.xlane.f32.xlu2 %v1186_v56 }
 0x29f   :  { %1639 = vmatmul.msk.bf16.gmra.mxu3 %vm1014_vm2, %v1006_v55  ;;  %v888_v60 = vmax.f32 %v854_v57, 0.0 }
 0x2a1   :  { %v920_v0 = vpack.c.bf16 %v888_v60, %v888_v60 }
 0x2a2   :  { %v1102_v58 = vpop.f32.mrf.mxu3 }
 0x2a3   :  { %v2194_v61 = vadd.f32 %v2113_v10, %v1102_v58  ;;  %v990_v5 = vunpack.c.l.b16 %v920_v0 }
 0x2a4   :  { %v855_v62 = vpop.f32.mrf.mxu2 }
 0x2a5   :  { %v856_v32 = vadd.f32 %v2060_v21, %v855_v62  ;;  %v1189_v63 = vsel %vm1152_vm3, %v2194_v61, -inf }
 0x2a6   :  { %1190 = vmax.xlane.f32.xlu0 %v1189_v63 }
 0x2a7   :  { %v889_v2 = vmax.f32 %v856_v32, 0.0 }
 0x2a9   :  { %v921_v3 = vpack.c.bf16 %v889_v2, %v889_v2 }
 0x2aa   :  { %v1104_v4 = vpop.f32.mrf.mxu3 }
 0x2ab   :  { %v991_v6 = vunpack.c.l.b16 %v921_v3  ;;  %v2200_v7 = vadd.f32 %v2113_v10, %v1104_v4 }
 0x2ad   :  { %v1007_v8 = vpack.c.b16 %v991_v6, %v990_v5  ;;  %v1192_v9 = vsel %vm1152_vm3, %v2200_v7, -inf }
 0x2ae   :  { %1193 = vmax.xlane.f32.xlu1 %v1192_v9 }
 0x2af   :  { %1640 = vmatmul.msk.bf16.gmra.mxu3 %vm1014_vm2, %v1007_v8 }
 0x2b2   :  { %v1107_v21 = vpop.f32.mrf.mxu3 }
 0x2b3   :  { %v2206_v11 = vadd.f32 %v2113_v10, %v1107_v21 }
 0x2b5   :  { %v1195_v14 = vsel %vm1152_vm3, %v2206_v11, -inf }
 0x2b6   :  { %1196 = vmax.xlane.f32.xlu2 %v1195_v14 }
 0x2b9   :  { %v1155_v15 = vpop.xlane.xlu0 %1154 }
 0x2ba   :  { %v1249_v16 = vsub.f32 %v2116_v13, %v1155_v15  ;;  %v1109_v17 = vpop.f32.mrf.mxu3 }
 0x2bb   :  { %v2212_v18 = vadd.f32 %v2113_v10, %v1109_v17 }
 0x2bc   :  { %v1281_v19 = vmul.f32 1.442695, %v1249_v16 }
 0x2bd   :  { %v1198_v22 = vsel %vm1152_vm3, %v2212_v18, -inf }
 0x2be   :  { %1654 = vpow2.f32 %v1281_v19  ;;  %1199 = vmax.xlane.f32.xlu0 %v1198_v22 }
 0x2c1   :  { %v1158_v23 = vpop.xlane.xlu0 %1157 }
 0x2c2   :  { %v1250_v25 = vsub.f32 %v2122_v24, %v1158_v23  ;;  %v1112_v26 = vpop.f32.mrf.mxu3 }
 0x2c3   :  { %v2218_v27 = vadd.f32 %v2113_v10, %v1112_v26 }
 0x2c4   :  { %v2220_v29 = vpop.eup %1654  ;;  %v1283_v13 = vmul.f32 1.442695, %v1250_v25 }
 0x2c5   :  { %v1201_v30 = vsel %vm1152_vm3, %v2218_v27, -inf  ;;  %v1345_v31 = vsel %vm1152_vm3, %v2220_v29, 0.0 }
 0x2c6   :  { %1656 = vpow2.f32 %v1283_v13  ;;  %1202 = vmax.xlane.f32.xlu1 %v1201_v30  ;;  %1346 = vadd.xlane.f32.xlu2 %v1345_v31 }
 0x2c9   :  { %v1161_v34 = vpop.xlane.xlu1 %1160 }
 0x2ca   :  { %v1251_v36 = vsub.f32 %v2129_v33, %v1161_v34  ;;  %v1114_v24 = vpop.f32.mrf.mxu3 }
 0x2cb   :  { %v2228_v37 = vadd.f32 %v2113_v10, %v1114_v24 }
 0x2cc   :  { %v2230_v38 = vpop.eup %1656  ;;  %v1285_v39 = vmul.f32 1.442695, %v1251_v36 }
 0x2cd   :  { %v1204_v40 = vsel %vm1152_vm3, %v2228_v37, -inf  ;;  %v1348_v41 = vsel %vm1152_vm3, %v2230_v38, 0.0 }
 0x2ce   :  { %1658 = vpow2.f32 %v1285_v39  ;;  %1205 = vmax.xlane.f32.xlu2 %v1204_v40  ;;  %1349 = vadd.xlane.f32.xlu0 %v1348_v41 }
 0x2d1   :  { %v1164_v44 = vpop.xlane.xlu1 %1163 }
 0x2d2   :  { %v1252_v45 = vsub.f32 %v2135_v43, %v1164_v44  ;;  %v1117_v33 = vpop.f32.mrf.mxu3 }
 0x2d3   :  { %v2238_v46 = vadd.f32 %v2113_v10, %v1117_v33 }
 0x2d4   :  { %v2240_v47 = vpop.eup %1658  ;;  %v1287_v48 = vmul.f32 1.442695, %v1252_v45 }
 0x2d5   :  { %v1351_v49 = vsel %vm1152_vm3, %v2240_v47, 0.0  ;;  %v1207_v28 = vsel %vm1152_vm3, %v2238_v46, -inf }
 0x2d6   :  { %1660 = vpow2.f32 %v1287_v48  ;;  %1352 = vadd.xlane.f32.xlu1 %v1351_v49  ;;  %1208 = vmax.xlane.f32.xlu0 %v1207_v28 }
 0x2d9   :  { %v1167_v51 = vpop.xlane.xlu2 %1166 }
 0x2da   :  { %v1253_v52 = vsub.f32 %v2142_v50, %v1167_v51  ;;  %v1119_v43 = vpop.f32.mrf.mxu3 }
 0x2db   :  { %v2248_v54 = vadd.f32 %v2113_v10, %v1119_v43 }
 0x2dc   :  { %v2250_v55 = vpop.eup %1660  ;;  %v1289_v56 = vmul.f32 1.442695, %v1253_v52 }
 0x2dd   :  { %v1210_v57 = vsel %vm1152_vm3, %v2248_v54, -inf  ;;  %v1354_v58 = vsel %vm1152_vm3, %v2250_v55, 0.0 }
 0x2de   :  { %1662 = vpow2.f32 %v1289_v56  ;;  %1211 = vmax.xlane.f32.xlu1 %v1210_v57  ;;  %1355 = vadd.xlane.f32.xlu2 %v1354_v58 }
 0x2e1   :  { %v1170_v60 = vpop.xlane.xlu2 %1169 }
 0x2e2   :  { %v1254_v62 = vsub.f32 %v2148_v59, %v1170_v60  ;;  %v1122_v50 = vpop.f32.mrf.mxu3 }
 0x2e3   :  { %v2258_v32 = vadd.f32 %v2113_v10, %v1122_v50 }
 0x2e4   :  { %v2260_v63 = vpop.eup %1662  ;;  %v1291_v0 = vmul.f32 1.442695, %v1254_v62 }
 0x2e5   :  { %v1213_v2 = vsel %vm1152_vm3, %v2258_v32, -inf  ;;  %v1357_v3 = vsel %vm1152_vm3, %v2260_v63, 0.0 }
 0x2e6   :  { %1664 = vpow2.f32 %v1291_v0  ;;  %1214 = vmax.xlane.f32.xlu2 %v1213_v2  ;;  %1358 = vadd.xlane.f32.xlu0 %v1357_v3 }
 0x2e9   :  { %v1173_v4 = vpop.xlane.xlu0 %1172 }
 0x2ea   :  { %v1255_v5 = vsub.f32 %v2155_v1, %v1173_v4  ;;  %v1124_v59 = vpop.f32.mrf.mxu3 }
 0x2eb   :  { %v2268_v6 = vadd.f32 %v2113_v10, %v1124_v59 }
 0x2ec   :  { %v2270_v8 = vpop.eup %1664  ;;  %v1293_v9 = vmul.f32 1.442695, %v1255_v5 }
 0x2ed   :  { %v1360_v21 = vsel %vm1152_vm3, %v2270_v8, 0.0  ;;  %v1216_v14 = vsel %vm1152_vm3, %v2268_v6, -inf }
 0x2ee   :  { %1666 = vpow2.f32 %v1293_v9  ;;  %1361 = vadd.xlane.f32.xlu1 %v1360_v21  ;;  %1217 = vmax.xlane.f32.xlu0 %v1216_v14 }
 0x2f1   :  { %v1176_v15 = vpop.xlane.xlu1 %1175 }
 0x2f2   :  { %v1256_v16 = vsub.f32 %v2161_v12, %v1176_v15  ;;  %v1127_v1 = vpop.f32.mrf.mxu3 }
 0x2f3   :  { %v2278_v17 = vadd.f32 %v2113_v10, %v1127_v1 }
 0x2f4   :  { %v2280_v19 = vpop.eup %1666  ;;  %v1295_v22 = vmul.f32 1.442695, %v1256_v16 }
 0x2f5   :  { %v1219_v23 = vsel %vm1152_vm3, %v2278_v17, -inf  ;;  %v1363_v25 = vsel %vm1152_vm3, %v2280_v19, 0.0 }
 0x2f6   :  { %1668 = vpow2.f32 %v1295_v22  ;;  %1220 = vmax.xlane.f32.xlu1 %v1219_v23  ;;  %1364 = vadd.xlane.f32.xlu2 %v1363_v25 }
 0x2f9   :  { %v1179_v26 = vpop.xlane.xlu2 %1178 }
 0x2fa   :  { %v1257_v13 = vsub.f32 %v2168_v20, %v1179_v26  ;;  %v1129_v12 = vpop.f32.mrf.mxu3 }
 0x2fb   :  { %v2288_v30 = vadd.f32 %v2113_v10, %v1129_v12 }
 0x2fc   :  { %v2290_v31 = vpop.eup %1668  ;;  %v1297_v34 = vmul.f32 1.442695, %v1257_v13 }
 0x2fd   :  { %v1366_v36 = vsel %vm1152_vm3, %v2290_v31, 0.0  ;;  %v1222_v24 = vsel %vm1152_vm3, %v2288_v30, -inf }
 0x2fe   :  { %1670 = vpow2.f32 %v1297_v34  ;;  %1367 = vadd.xlane.f32.xlu0 %v1366_v36  ;;  %1223 = vmax.xlane.f32.xlu2 %v1222_v24 }
 0x301   :  { %v1182_v39 = vpop.xlane.xlu0 %1181 }
 0x302   :  { %v1258_v40 = vsub.f32 %v2174_v35, %v1182_v39  ;;  %v1132_v20 = vpop.f32.mrf.mxu3 }
 0x303   :  { %v2298_v41 = vadd.f32 %v2113_v10, %v1132_v20 }
 0x304   :  { %v2300_v44 = vpop.eup %1670  ;;  %v1299_v45 = vmul.f32 1.442695, %v1258_v40 }
 0x305   :  { %v1369_v33 = vsel %vm1152_vm3, %v2300_v44, 0.0  ;;  %v1225_v48 = vsel %vm1152_vm3, %v2298_v41, -inf }
 0x306   :  { %1672 = vpow2.f32 %v1299_v45  ;;  %1370 = vadd.xlane.f32.xlu1 %v1369_v33  ;;  %1226 = vmax.xlane.f32.xlu0 %v1225_v48 }
 0x309   :  { %v1185_v49 = vpop.xlane.xlu1 %1184 }
 0x30a   :  { %v1259_v28 = vsub.f32 %v2181_v42, %v1185_v49  ;;  %v1134_v35 = vpop.f32.mrf.mxu3 }
 0x30b   :  { %v2308_v51 = vadd.f32 %v2113_v10, %v1134_v35 }
 0x30c   :  { %v2310_v52 = vpop.eup %1672  ;;  %v1301_v43 = vmul.f32 1.442695, %v1259_v28 }
 0x30d   :  { %v1228_v56 = vsel %vm1152_vm3, %v2308_v51, -inf  ;;  %v1372_v57 = vsel %vm1152_vm3, %v2310_v52, 0.0 }
 0x30e   :  { %1674 = vpow2.f32 %v1301_v43  ;;  %1229 = vmax.xlane.f32.xlu1 %v1228_v56  ;;  %1373 = vadd.xlane.f32.xlu2 %v1372_v57 }
 0x311   :  { %v1188_v15 = vpop.xlane.xlu2 %1187 }
 0x312   :  { %v1137_v58 = vpop.f32.mrf.mxu3  ;;  %v1260_v39 = vsub.f32 %v2187_v53, %v1188_v15 }
 0x313   :  { %v2317_v60 = vadd.f32 %v2113_v10, %v1137_v58 }
 0x314   :  { %v2319_v42 = vpop.eup %1674  ;;  %v1303_v45 = vmul.f32 1.442695, %v1260_v39 }
 0x315   :  { %v1375_v62 = vsel %vm1152_vm3, %v2319_v42, 0.0  ;;  %v1231_v50 = vsel %vm1152_vm3, %v2317_v60, -inf }
 0x316   :  { %1376 = vadd.xlane.f32.xlu0 %v1375_v62  ;;  %1232 = vmax.xlane.f32.xlu2 %v1231_v50 }
 0x319   :  { %v1191_v4 = vpop.xlane.xlu0 %1190 }
 0x31a   :  { %v1139_v0 = vpop.f32.mrf.mxu3  ;;  %v1261_v9 = vsub.f32 %v2194_v61, %v1191_v4 }
 0x31b   :  { %v2326_v2 = vadd.f32 %v2113_v10, %v1139_v0 }
 0x31c   :  { %v1305_v14 = vmul.f32 1.442695, %v1261_v9 }
 0x31d   :  { %v1234_v3 = vsel %vm1152_vm3, %v2326_v2, -inf }
 0x31e   :  { %1235 = vmax.xlane.f32.xlu0 %v1234_v3  ;;  %1676 = vpow2.f32 %v1305_v14 }
 0x321   :  { %v1194_v16 = vpop.xlane.xlu1 %1193 }
 0x322   :  { %v1142_v5 = vpop.f32.mrf.mxu3  ;;  %v1262_v23 = vsub.f32 %v2200_v7, %v1194_v16 }
 0x323   :  { %v2331_v59 = vadd.f32 %v2113_v10, %v1142_v5 }
 0x324   :  { %v1307_v26 = vmul.f32 1.442695, %v1262_v23  ;;  %v2342_v12 = vpop.eup %1676 }
 0x325   :  { %v1237_v21 = vsel %vm1152_vm3, %v2331_v59, -inf  ;;  %v1381_v20 = vsel %vm1152_vm3, %v2342_v12, 0.0 }
 0x326   :  { %1238 = vmax.xlane.f32.xlu1 %v1237_v21  ;;  %1678 = vpow2.f32 %v1307_v26 }
 0x329   :  { %v1197_v61 = vpop.xlane.xlu2 %1196 }
 0x32a   :  { %v1144_v1 = vpop.f32.mrf.mxu3  ;;  %v1263_v43 = vsub.f32 %v2206_v11, %v1197_v61 }
 0x32b   :  { %v2337_v22 = vadd.f32 %v2113_v10, %v1144_v1 }
 0x32c   :  { %v2353_v48 = vpop.eup %1678  ;;  %v1309_v62 = vmul.f32 1.442695, %v1263_v43 }
 0x32d   :  { %v1240_v25 = vsel %vm1152_vm3, %v2337_v22, -inf  ;;  %v1384_v58 = vsel %vm1152_vm3, %v2353_v48, 0.0 }
 0x32e   :  { %1241 = vmax.xlane.f32.xlu2 %v1240_v25 }
 0x331   :  { %v1200_v13 = vpop.xlane.xlu0 %1199 }
 0x332   :  { %v1264_v34 = vsub.f32 %v2212_v18, %v1200_v13  ;;  %v1147_v36 = vpop.f32.mrf.mxu3 }
 0x333   :  { %v2346_v24 = vadd.f32 %v2113_v10, %v1147_v36 }
 0x334   :  { %v1311_v40 = vmul.f32 1.442695, %v1264_v34 }
 0x335   :  { %v1243_v7 = vsel %vm1152_vm3, %v2346_v24, -inf }
 0x336   :  { %1680 = vpow2.f32 %v1311_v40  ;;  %1244 = vmax.xlane.f32.xlu0 %v1243_v7  ;;  %1382 = vadd.xlane.f32.xlu2 %v1381_v20 }
 0x339   :  { %v1203_v33 = vpop.xlane.xlu1 %1202  ;;  %v1347_v18 = vpop.xlane.xlu2 %1346 }
 0x33a   :  { %v1265_v49 = vsub.f32 %v2218_v27, %v1203_v33  ;;  %1682 = vrcp.f32 %v1347_v18  ;;  %v1149_v53 = vpop.f32.mrf.mxu3 }
 0x33b   :  { %v2357_v28 = vadd.f32 %v2113_v10, %v1149_v53  ;;  %1684 = vpow2.f32 %v1303_v45 }
 0x33c   :  { %v2359_v35 = vpop.eup %1680  ;;  %v1313_v56 = vmul.f32 1.442695, %v1265_v49 }
 0x33d   :  { %v1246_v57 = vsel %vm1152_vm3, %v2357_v28, -inf  ;;  %v1390_v27 = vsel %vm1152_vm3, %v2359_v35, 0.0 }
 0x33e   :  { %1686 = vpow2.f32 %v1313_v56  ;;  %1247 = vmax.xlane.f32.xlu1 %v1246_v57  ;;  %1385 = vadd.xlane.f32.xlu0 %v1384_v58 }
 0x33f   :  { %1391 = vadd.xlane.f32.xlu2 %v1390_v27 }
 0x340   :  { %v1683_v10 = vpop.eup %1682 }
 0x341   :  { %v1473_v50 = vmul.f32 %v1683_v10, %v2220_v29  ;;  %v1206_v0 = vpop.xlane.xlu2 %1205  ;;  %v1350_v11 = vpop.xlane.xlu0 %1349 }
 0x342   :  { %v2369_v3 = vpop.eup %1684  ;;  %1688 = vrcp.f32 %v1350_v11  ;;  %v1266_v5 = vsub.f32 %v2228_v37, %v1206_v0 }
 0x343   :  { %1505 = vst.msk [vmem:[%s2624_s9] sm:$0xff] %vm1152_vm3, %v1473_v50  ;;  %1690 = vpow2.f32 %v1309_v62  ;;  %v1378_v9 = vsel %vm1152_vm3, %v2369_v3, 0.0 }
 0x344   :  { %v2375_v4 = vpop.eup %1686  ;;  %v1315_v14 = vmul.f32 1.442695, %v1266_v5 }
 0x345   :  { %v1393_v29 = vsel %vm1152_vm3, %v2375_v4, 0.0 }
 0x346   :  { %1379 = vadd.xlane.f32.xlu1 %v1378_v9  ;;  %1394 = vadd.xlane.f32.xlu0 %v1393_v29 }
 0x348   :  { %v1689_v21 = vpop.eup %1688 }
 0x349   :  { %v1474_v15 = vmul.f32 %v1689_v21, %v2230_v38  ;;  %v1353_v16 = vpop.xlane.xlu1 %1352  ;;  %v1209_v1 = vpop.xlane.xlu0 %1208 }
 0x34a   :  { %v2383_v23 = vpop.eup %1690  ;;  %1692 = vrcp.f32 %v1353_v16  ;;  %v1267_v25 = vsub.f32 %v2238_v46, %v1209_v1 }
 0x34b   :  { %1506 = vst.msk [vmem:[%s2624_s9 + $0x8] sm:$0xff] %vm1152_vm3, %v1474_v15  ;;  %1694 = vpow2.f32 %v1315_v14  ;;  %v1387_v26 = vsel %vm1152_vm3, %v2383_v23, 0.0 }
 0x34c   :  { %v1317_v37 = vmul.f32 1.442695, %v1267_v25 }
 0x34e   :  { %1696 = vpow2.f32 %v1317_v37  ;;  %1388 = vadd.xlane.f32.xlu1 %v1387_v26 }
 0x350   :  { %v1693_v38 = vpop.eup %1692 }
 0x351   :  { %v1475_v61 = vmul.f32 %v1693_v38, %v2240_v47  ;;  %v1212_v13 = vpop.xlane.xlu1 %1211  ;;  %v1356_v34 = vpop.xlane.xlu2 %1355 }
 0x352   :  { %v2393_v36 = vpop.eup %1694  ;;  %v1268_v46 = vsub.f32 %v2248_v54, %v1212_v13  ;;  %1698 = vrcp.f32 %v1356_v34 }
 0x353   :  { %1507 = vst.msk [vmem:[%s2624_s9 + $0x10] sm:$0xff] %vm1152_vm3, %v1475_v61  ;;  %v1396_v7 = vsel %vm1152_vm3, %v2393_v36, 0.0 }
 0x354   :  { %v2400_v39 = vpop.eup %1696  ;;  %v1319_v40 = vmul.f32 1.442695, %v1268_v46 }
 0x355   :  { %v1399_v47 = vsel %vm1152_vm3, %v2400_v39, 0.0 }
 0x356   :  { %1700 = vpow2.f32 %v1319_v40  ;;  %1397 = vadd.xlane.f32.xlu1 %v1396_v7  ;;  %1400 = vadd.xlane.f32.xlu2 %v1399_v47 }
 0x358   :  { %v1699_v20 = vpop.eup %1698 }
 0x359   :  { %v1476_v54 = vmul.f32 %v1699_v20, %v2250_v55  ;;  %v1215_v45 = vpop.xlane.xlu2 %1214  ;;  %v1359_v33 = vpop.xlane.xlu0 %1358 }
 0x35a   :  { %v1269_v18 = vsub.f32 %v2258_v32, %v1215_v45  ;;  %1702 = vrcp.f32 %v1359_v33 }
 0x35b   :  { %1508 = vst.msk [vmem:[%s2624_s9 + $0x18] sm:$0xff] %vm1152_vm3, %v1476_v54 }
 0x35c   :  { %v2412_v49 = vpop.eup %1700  ;;  %v1321_v53 = vmul.f32 1.442695, %v1269_v18 }
 0x35d   :  { %v1402_v43 = vsel %vm1152_vm3, %v2412_v49, 0.0 }
 0x35e   :  { %1704 = vpow2.f32 %v1321_v53  ;;  %1403 = vadd.xlane.f32.xlu0 %v1402_v43 }
 0x360   :  { %v1703_v56 = vpop.eup %1702 }
 0x361   :  { %v1477_v55 = vmul.f32 %v1703_v56, %v2260_v63  ;;  %v1362_v57 = vpop.xlane.xlu1 %1361  ;;  %v1218_v58 = vpop.xlane.xlu0 %1217 }
 0x362   :  { %1706 = vrcp.f32 %v1362_v57  ;;  %v1270_v32 = vsub.f32 %v2268_v6, %v1218_v58 }
 0x363   :  { %1509 = vst.msk [vmem:[%s2624_s9 + $0x20] sm:$0xff] %vm1152_vm3, %v1477_v55 }
 0x364   :  { %v2422_v27 = vpop.eup %1704  ;;  %v1323_v10 = vmul.f32 1.442695, %v1270_v32 }
 0x365   :  { %v1405_v62 = vsel %vm1152_vm3, %v2422_v27, 0.0 }
 0x366   :  { %1708 = vpow2.f32 %v1323_v10  ;;  %1406 = vadd.xlane.f32.xlu1 %v1405_v62 }
 0x368   :  { %v1707_v50 = vpop.eup %1706 }
 0x369   :  { %v1478_v63 = vmul.f32 %v1707_v50, %v2270_v8  ;;  %v1221_v0 = vpop.xlane.xlu1 %1220  ;;  %v1365_v11 = vpop.xlane.xlu2 %1364 }
 0x36a   :  { %v1271_v6 = vsub.f32 %v2278_v17, %v1221_v0  ;;  %1710 = vrcp.f32 %v1365_v11 }
 0x36b   :  { %1510 = vst.msk [vmem:[%s2624_s9 + $0x28] sm:$0xff] %vm1152_vm3, %v1478_v63 }
 0x36c   :  { %v2432_v5 = vpop.eup %1708  ;;  %v1325_v9 = vmul.f32 1.442695, %v1271_v6 }
 0x36d   :  { %v1408_v29 = vsel %vm1152_vm3, %v2432_v5, 0.0 }
 0x36e   :  { %1712 = vpow2.f32 %v1325_v9  ;;  %1409 = vadd.xlane.f32.xlu2 %v1408_v29 }
 0x370   :  { %v1711_v21 = vpop.eup %1710 }
 0x371   :  { %v1479_v8 = vmul.f32 %v1711_v21, %v2280_v19  ;;  %v1224_v14 = vpop.xlane.xlu2 %1223  ;;  %v1368_v15 = vpop.xlane.xlu0 %1367 }
 0x372   :  { %v1272_v17 = vsub.f32 %v2288_v30, %v1224_v14  ;;  %1714 = vrcp.f32 %v1368_v15 }
 0x373   :  { %1511 = vst.msk [vmem:[%s2624_s9 + $0x30] sm:$0xff] %vm1152_vm3, %v1479_v8 }
 0x374   :  { %v2442_v16 = vpop.eup %1712  ;;  %v1327_v1 = vmul.f32 1.442695, %v1272_v17 }
 0x375   :  { %v1411_v25 = vsel %vm1152_vm3, %v2442_v16, 0.0 }
 0x376   :  { %1716 = vpow2.f32 %v1327_v1  ;;  %1412 = vadd.xlane.f32.xlu0 %v1411_v25 }
 0x378   :  { %v1715_v37 = vpop.eup %1714 }
 0x379   :  { %v1480_v19 = vmul.f32 %v1715_v37, %v2290_v31  ;;  %v1371_v26 = vpop.xlane.xlu1 %1370  ;;  %v1227_v38 = vpop.xlane.xlu0 %1226 }
 0x37a   :  { %1718 = vrcp.f32 %v1371_v26  ;;  %v1273_v30 = vsub.f32 %v2298_v41, %v1227_v38 }
 0x37b   :  { %1512 = vst.msk [vmem:[%s2624_s9 + $0x38] sm:$0xff] %vm1152_vm3, %v1480_v19 }
 0x37c   :  { %v2452_v61 = vpop.eup %1716  ;;  %v1329_v13 = vmul.f32 1.442695, %v1273_v30 }
 0x37d   :  { %v1414_v34 = vsel %vm1152_vm3, %v2452_v61, 0.0 }
 0x37e   :  { %1720 = vpow2.f32 %v1329_v13  ;;  %1415 = vadd.xlane.f32.xlu1 %v1414_v34 }
 0x380   :  { %v1719_v46 = vpop.eup %1718 }
 0x381   :  { %v1481_v31 = vmul.f32 %v1719_v46, %v2300_v44  ;;  %v1230_v40 = vpop.xlane.xlu1 %1229  ;;  %v1374_v7 = vpop.xlane.xlu2 %1373 }
 0x382   :  { %v1274_v41 = vsub.f32 %v2308_v51, %v1230_v40  ;;  %1722 = vrcp.f32 %v1374_v7 }
 0x383   :  { %1513 = vst.msk [vmem:[%s2624_s9 + $0x40] sm:$0xff] %vm1152_vm3, %v1481_v31 }
 0x384   :  { %v2462_v47 = vpop.eup %1720  ;;  %v1331_v20 = vmul.f32 1.442695, %v1274_v41 }
 0x385   :  { %v1417_v54 = vsel %vm1152_vm3, %v2462_v47, 0.0 }
 0x386   :  { %1724 = vpow2.f32 %v1331_v20  ;;  %1418 = vadd.xlane.f32.xlu2 %v1417_v54 }
 0x388   :  { %v1723_v45 = vpop.eup %1722 }
 0x389   :  { %v1482_v44 = vmul.f32 %v1723_v45, %v2310_v52  ;;  %v1233_v33 = vpop.xlane.xlu2 %1232  ;;  %v1377_v18 = vpop.xlane.xlu0 %1376 }
 0x38a   :  { %v1275_v51 = vsub.f32 %v2317_v60, %v1233_v33  ;;  %1726 = vrcp.f32 %v1377_v18 }
 0x38b   :  { %1514 = vst.msk [vmem:[%s2624_s9 + $0x48] sm:$0xff] %vm1152_vm3, %v1482_v44 }
 0x38c   :  { %v2472_v53 = vpop.eup %1724  ;;  %v1333_v43 = vmul.f32 1.442695, %v1275_v51 }
 0x38d   :  { %v1420_v56 = vsel %vm1152_vm3, %v2472_v53, 0.0 }
 0x38e   :  { %1728 = vpow2.f32 %v1333_v43  ;;  %1421 = vadd.xlane.f32.xlu0 %v1420_v56 }
 0x390   :  { %v1727_v55 = vpop.eup %1726 }
 0x391   :  { %v1483_v52 = vmul.f32 %v1727_v55, %v2319_v42  ;;  %v1236_v57 = vpop.xlane.xlu0 %1235 }
 0x392   :  { %v1276_v60 = vsub.f32 %v2326_v2, %v1236_v57 }
 0x393   :  { %1515 = vst.msk [vmem:[%s2624_s9 + $0x50] sm:$0xff] %vm1152_vm3, %v1483_v52 }
 0x394   :  { %v2482_v58 = vpop.eup %1728  ;;  %v1335_v32 = vmul.f32 1.442695, %v1276_v60 }
 0x395   :  { %v1423_v10 = vsel %vm1152_vm3, %v2482_v58, 0.0 }
 0x396   :  { %1730 = vpow2.f32 %v1335_v32  ;;  %1424 = vadd.xlane.f32.xlu1 %v1423_v10 }
 0x399   :  { %v1239_v62 = vpop.xlane.xlu1 %1238 }
 0x39a   :  { %v1277_v50 = vsub.f32 %v2331_v59, %v1239_v62 }
 0x39c   :  { %v2487_v42 = vpop.eup %1730  ;;  %v1337_v63 = vmul.f32 1.442695, %v1277_v50 }
 0x39d   :  { %v1426_v2 = vsel %vm1152_vm3, %v2487_v42, 0.0 }
 0x39e   :  { %1732 = vpow2.f32 %v1337_v63  ;;  %1427 = vadd.xlane.f32.xlu2 %v1426_v2 }
 0x3a1   :  { %v1242_v0 = vpop.xlane.xlu2 %1241 }
 0x3a2   :  { %v1278_v11 = vsub.f32 %v2337_v22, %v1242_v0 }
 0x3a4   :  { %v2492_v6 = vpop.eup %1732  ;;  %v1339_v9 = vmul.f32 1.442695, %v1278_v11 }
 0x3a5   :  { %v1429_v29 = vsel %vm1152_vm3, %v2492_v6, 0.0 }
 0x3a6   :  { %1734 = vpow2.f32 %v1339_v9  ;;  %1430 = vadd.xlane.f32.xlu0 %v1429_v29 }
 0x3a9   :  { %v1383_v59 = vpop.xlane.xlu2 %1382  ;;  %v1245_v21 = vpop.xlane.xlu0 %1244 }
 0x3aa   :  { %1736 = vrcp.f32 %v1383_v59  ;;  %v1279_v8 = vsub.f32 %v2346_v24, %v1245_v21 }
 0x3ac   :  { %v2497_v14 = vpop.eup %1734  ;;  %v1341_v15 = vmul.f32 1.442695, %v1279_v8 }
 0x3ad   :  { %v1432_v17 = vsel %vm1152_vm3, %v2497_v14, 0.0 }
 0x3ae   :  { %1738 = vpow2.f32 %v1341_v15  ;;  %1433 = vadd.xlane.f32.xlu1 %v1432_v17 }
 0x3b0   :  { %v1737_v22 = vpop.eup %1736 }
 0x3b1   :  { %v1485_v1 = vmul.f32 %v1737_v22, %v2342_v12  ;;  %v1248_v25 = vpop.xlane.xlu1 %1247  ;;  %v1386_v37 = vpop.xlane.xlu0 %1385 }
 0x3b2   :  { %v1280_v19 = vsub.f32 %v2357_v28, %v1248_v25  ;;  %v1392_v26 = vpop.xlane.xlu2 %1391  ;;  %1740 = vrcp.f32 %v1386_v37 }
 0x3b3   :  { %1517 = vst.msk [vmem:[%s2624_s9 + $0x60] sm:$0xff] %vm1152_vm3, %v1485_v1  ;;  %1742 = vrcp.f32 %v1392_v26 }
 0x3b4   :  { %v2507_v24 = vpop.eup %1738  ;;  %v1343_v38 = vmul.f32 1.442695, %v1280_v19 }
 0x3b5   :  { %v1435_v30 = vsel %vm1152_vm3, %v2507_v24, 0.0 }
 0x3b6   :  { %1744 = vpow2.f32 %v1343_v38  ;;  %1436 = vadd.xlane.f32.xlu2 %v1435_v30 }
 0x3b8   :  { %v1741_v12 = vpop.eup %1740 }
 0x3b9   :  { %v1743_v13 = vpop.eup %1742  ;;  %v1486_v28 = vmul.f32 %v1741_v12, %v2353_v48  ;;  %v1380_v34 = vpop.xlane.xlu1 %1379 }
 0x3ba   :  { %v1395_v46 = vpop.xlane.xlu0 %1394  ;;  %v1488_v31 = vmul.f32 %v1743_v13, %v2359_v35  ;;  %1746 = vrcp.f32 %v1380_v34 }
 0x3bb   :  { %1518 = vst.msk [vmem:[%s2624_s9 + $0x68] sm:$0xff] %vm1152_vm3, %v1486_v28  ;;  %1748 = vrcp.f32 %v1395_v46 }
 0x3bc   :  { %v2517_v40 = vpop.eup %1744  ;;  %1520 = vst.msk [vmem:[%s2624_s9 + $0x78] sm:$0xff] %vm1152_vm3, %v1488_v31 }
 0x3bd   :  { %v1438_v48 = vsel %vm1152_vm3, %v2517_v40, 0.0 }
 0x3be   :  { %1439 = vadd.xlane.f32.xlu0 %v1438_v48 }
 0x3c0   :  { %v1747_v7 = vpop.eup %1746 }
 0x3c1   :  { %v1749_v35 = vpop.eup %1748  ;;  %v1484_v41 = vmul.f32 %v1747_v7, %v2369_v3  ;;  %v1389_v20 = vpop.xlane.xlu1 %1388 }
 0x3c2   :  { %v1489_v54 = vmul.f32 %v1749_v35, %v2375_v4  ;;  %1750 = vrcp.f32 %v1389_v20 }
 0x3c3   :  { %1516 = vst.msk [vmem:[%s2624_s9 + $0x58] sm:$0xff] %vm1152_vm3, %v1484_v41 }
 0x3c4   :  { %1521 = vst.msk [vmem:[%s2624_s9 + $0x80] sm:$0xff] %vm1152_vm3, %v1489_v54 }
 0x3c8   :  { %v1751_v45 = vpop.eup %1750 }
 0x3c9   :  { %v1487_v44 = vmul.f32 %v1751_v45, %v2383_v23  ;;  %v1398_v33 = vpop.xlane.xlu1 %1397  ;;  %v1401_v18 = vpop.xlane.xlu2 %1400 }
 0x3ca   :  { %1752 = vrcp.f32 %v1398_v33 }
 0x3cb   :  { %1519 = vst.msk [vmem:[%s2624_s9 + $0x70] sm:$0xff] %vm1152_vm3, %v1487_v44  ;;  %1754 = vrcp.f32 %v1401_v18 }
 0x3d0   :  { %v1753_v3 = vpop.eup %1752 }
 0x3d1   :  { %v1755_v4 = vpop.eup %1754  ;;  %v1490_v51 = vmul.f32 %v1753_v3, %v2393_v36  ;;  %v1404_v43 = vpop.xlane.xlu0 %1403 }
 0x3d2   :  { %v1491_v56 = vmul.f32 %v1755_v4, %v2400_v39  ;;  %1756 = vrcp.f32 %v1404_v43 }
 0x3d3   :  { %1522 = vst.msk [vmem:[%s2624_s9 + $0x88] sm:$0xff] %vm1152_vm3, %v1490_v51 }
 0x3d4   :  { %1523 = vst.msk [vmem:[%s2624_s9 + $0x90] sm:$0xff] %vm1152_vm3, %v1491_v56 }
 0x3d8   :  { %v1757_v23 = vpop.eup %1756 }
 0x3d9   :  { %v1492_v55 = vmul.f32 %v1757_v23, %v2412_v49  ;;  %v1407_v52 = vpop.xlane.xlu1 %1406 }
 0x3da   :  { %1758 = vrcp.f32 %v1407_v52 }
 0x3db   :  { %1524 = vst.msk [vmem:[%s2624_s9 + $0x98] sm:$0xff] %vm1152_vm3, %v1492_v55 }
 0x3e0   :  { %v1759_v36 = vpop.eup %1758 }
 0x3e1   :  { %v1493_v39 = vmul.f32 %v1759_v36, %v2422_v27  ;;  %v1410_v57 = vpop.xlane.xlu2 %1409 }
 0x3e2   :  { %1760 = vrcp.f32 %v1410_v57 }
 0x3e3   :  { %1525 = vst.msk [vmem:[%s2624_s9 + $0xa0] sm:$0xff] %vm1152_vm3, %v1493_v39 }
 0x3e8   :  { %v1761_v60 = vpop.eup %1760 }
 0x3e9   :  { %v1494_v49 = vmul.f32 %v1761_v60, %v2432_v5  ;;  %v1413_v32 = vpop.xlane.xlu0 %1412 }
 0x3ea   :  { %1762 = vrcp.f32 %v1413_v32 }
 0x3eb   :  { %1526 = vst.msk [vmem:[%s2624_s9 + $0xa8] sm:$0xff] %vm1152_vm3, %v1494_v49 }
 0x3f0   :  { %v1763_v10 = vpop.eup %1762 }
 0x3f1   :  { %v1495_v27 = vmul.f32 %v1763_v10, %v2442_v16  ;;  %v1416_v62 = vpop.xlane.xlu1 %1415 }
 0x3f2   :  { %1764 = vrcp.f32 %v1416_v62 }
 0x3f3   :  { %1527 = vst.msk [vmem:[%s2624_s9 + $0xb0] sm:$0xff] %vm1152_vm3, %v1495_v27 }
 0x3f8   :  { %v1765_v50 = vpop.eup %1764 }
 0x3f9   :  { %v1496_v5 = vmul.f32 %v1765_v50, %v2452_v61  ;;  %v1419_v63 = vpop.xlane.xlu2 %1418 }
 0x3fa   :  { %1766 = vrcp.f32 %v1419_v63 }
 0x3fb   :  { %1528 = vst.msk [vmem:[%s2624_s9 + $0xb8] sm:$0xff] %vm1152_vm3, %v1496_v5 }
 0x400   :  { %v1767_v2 = vpop.eup %1766 }
 0x401   :  { %v1497_v16 = vmul.f32 %v1767_v2, %v2462_v47  ;;  %v1422_v0 = vpop.xlane.xlu0 %1421 }
 0x402   :  { %1768 = vrcp.f32 %v1422_v0 }
 0x403   :  { %1529 = vst.msk [vmem:[%s2624_s9 + $0xc0] sm:$0xff] %vm1152_vm3, %v1497_v16 }
 0x408   :  { %v1769_v11 = vpop.eup %1768 }
 0x409   :  { %v1498_v61 = vmul.f32 %v1769_v11, %v2472_v53  ;;  %v1425_v9 = vpop.xlane.xlu1 %1424 }
 0x40a   :  { %1770 = vrcp.f32 %v1425_v9 }
 0x40b   :  { %1530 = vst.msk [vmem:[%s2624_s9 + $0xc8] sm:$0xff] %vm1152_vm3, %v1498_v61 }
 0x410   :  { %v1771_v29 = vpop.eup %1770 }
 0x411   :  { %v1499_v47 = vmul.f32 %v1771_v29, %v2482_v58  ;;  %v1428_v59 = vpop.xlane.xlu2 %1427 }
 0x412   :  { %1772 = vrcp.f32 %v1428_v59 }
 0x413   :  { %1531 = vst.msk [vmem:[%s2624_s9 + $0xd0] sm:$0xff] %vm1152_vm3, %v1499_v47 }
 0x418   :  { %v1773_v21 = vpop.eup %1772 }
 0x419   :  { %v1500_v53 = vmul.f32 %v1773_v21, %v2487_v42  ;;  %v1431_v8 = vpop.xlane.xlu0 %1430 }
 0x41a   :  { %1774 = vrcp.f32 %v1431_v8 }
 0x41b   :  { %1532 = vst.msk [vmem:[%s2624_s9 + $0xd8] sm:$0xff] %vm1152_vm3, %v1500_v53 }
 0x420   :  { %v1775_v15 = vpop.eup %1774 }
 0x421   :  { %v1501_v58 = vmul.f32 %v1775_v15, %v2492_v6  ;;  %v1434_v17 = vpop.xlane.xlu1 %1433 }
 0x422   :  { %1776 = vrcp.f32 %v1434_v17 }
 0x423   :  { %1533 = vst.msk [vmem:[%s2624_s9 + $0xe0] sm:$0xff] %vm1152_vm3, %v1501_v58 }
 0x428   :  { %v1777_v22 = vpop.eup %1776 }
 0x429   :  { %v1502_v42 = vmul.f32 %v1777_v22, %v2497_v14  ;;  %v1437_v1 = vpop.xlane.xlu2 %1436 }
 0x42a   :  { %1778 = vrcp.f32 %v1437_v1 }
 0x42b   :  { %1534 = vst.msk [vmem:[%s2624_s9 + $0xe8] sm:$0xff] %vm1152_vm3, %v1502_v42 }
 0x430   :  { %v1779_v25 = vpop.eup %1778 }
 0x431   :  { %v1503_v6 = vmul.f32 %v1779_v25, %v2507_v24  ;;  %v1440_v37 = vpop.xlane.xlu0 %1439 }
 0x432   :  { %1780 = vrcp.f32 %v1440_v37 }
 0x433   :  { %1535 = vst.msk [vmem:[%s2624_s9 + $0xf0] sm:$0xff] %vm1152_vm3, %v1503_v6 }
 0x438   :  { %v1781_v19 = vpop.eup %1780 }
 0x439   :  { %v1504_v14 = vmul.f32 %v1781_v19, %v2517_v40 }
 0x43b   :  { %1536 = vst.msk [vmem:[%s2624_s9 + $0xf8] sm:$0xff] %vm1152_vm3, %v1504_v14 }

</bundles_post_ra>
